<compile_context>
chip_gen: v6e
topology: v6e:2x2x1
jax: 0.10.0
libtpu: 0.0.40
codegen_flags: <defaults>
</compile_context>

<pallas_src>
import jax
import jax.numpy as jnp
from jax import lax
from jax.experimental import pallas as pl
from jax.experimental.pallas import tpu as pltpu

LANE = 128


# ----------------------------------------------------------------------------
# Fused Pallas kernel (all blocks + head)
# ----------------------------------------------------------------------------
def _make_fused_tcn_kernel(meta, B, L, K, Cpad):
    """meta: tuple of (dilation, has_downsample) per TemporalBlock (static)."""
    n_w = sum(6 if has_ds else 4 for _, has_ds in meta)

    def kernel(*refs):
        x_ref = refs[0]                    # (B, L, Cpad) zero-padded input
        w_refs = refs[1:1 + n_w]           # packed conv weights / biases per block
        lin_w_ref = refs[1 + n_w]          # (Cpad, 1)
        lin_b_ref = refs[2 + n_w]          # (1, 1)
        out_ref = refs[3 + n_w]            # (B, 1)
        col_ref = refs[4 + n_w]            # VMEM scratch (B, L, K*Cpad) for im2col

        def causal_conv_relu(h, w_ref, b_ref, d):
            # h: (B, L, Cpad).  Dilated causal conv (left-pad (K-1)*d + chomp) fused
            # into ONE matmul over an im2col operand built in the VMEM scratch:
            #   col[:, t, k*Cpad:(k+1)*Cpad] = h[:, t - (K-1-k)*d]   (zero for t < shift)
            for k in range(K):
                s = (K - 1 - k) * d
                lo, hi = k * Cpad, (k + 1) * Cpad
                if s == 0:
                    col_ref[:, :, lo:hi] = h
                elif s >= L:
                    col_ref[:, :, lo:hi] = jnp.zeros((B, L, Cpad), jnp.float32)
                else:
                    col_ref[:, :s, lo:hi] = jnp.zeros((B, s, Cpad), jnp.float32)
                    col_ref[:, s:, lo:hi] = h[:, :L - s, :]
            col = col_ref[...].reshape(B * L, K * Cpad)
            y = jnp.dot(col, w_ref[...], preferred_element_type=jnp.float32)
            y = y.reshape(B, L, Cpad) + b_ref[...]
            return jnp.maximum(y, 0.0)

        h = x_ref[...]                     # (B, L, Cpad); padded channels are zero
        pos = 0
        for d, has_ds in meta:
            w1, b1, w2, b2 = w_refs[pos:pos + 4]
            pos += 4
            o = causal_conv_relu(h, w1, b1, d)     # conv1 + chomp + relu
            o = causal_conv_relu(o, w2, b2, d)     # conv2 + chomp + relu
            if has_ds:                             # 1x1 downsample residual
                wd, bd = w_refs[pos:pos + 2]
                pos += 2
                res = jnp.dot(h.reshape(B * L, Cpad), wd[...],
                              preferred_element_type=jnp.float32)
                res = res.reshape(B, L, Cpad) + bd[...]
            else:                                  # identity residual: skip the matmul
                res = h
            h = jnp.maximum(o + res, 0.0)

        # Head: AdaptiveAvgPool1d(1) over time + Linear(C -> 1).
        pooled = jnp.mean(h, axis=1)               # (B, Cpad)
        out_ref[...] = jnp.dot(pooled, lin_w_ref[...],
                               preferred_element_type=jnp.float32) + lin_b_ref[...]

    return kernel


# ----------------------------------------------------------------------------
# Wrapper: pack / pad weights, single pallas_call
# ----------------------------------------------------------------------------
def _pack_conv_weight(w_kio, cpad):
    """(K, Cin, Cout) -> zero-padded (K*cpad, cpad) for the fused im2col matmul."""
    K, cin, cout = w_kio.shape
    w = jnp.zeros((K, cpad, cpad), jnp.float32).at[:, :cin, :cout].set(w_kio)
    return w.reshape(K * cpad, cpad)


def _pack_bias(b_1c, cpad):
    return jnp.pad(b_1c, ((0, 0), (0, cpad - b_1c.shape[-1])))


def tcn_forward(x, params, kernel_size):
    """x: (B, L) float32 -> (B,) float32 (matches TCN.forward)."""
    B, L = x.shape
    blocks = params["blocks"]
    max_c = max(blk["w1"].shape[2] for blk in blocks)
    cpad = LANE * ((max_c + LANE - 1) // LANE)      # lane-dense channel width

    # (B, L) -> channels-last (B, L, cpad); the single real input channel lives at 0.
    xp = jnp.zeros((B, L, cpad), jnp.float32).at[:, :, 0].set(x)

    flat_w = []
    meta = []
    for i, blk in enumerate(blocks):
        d = 2 ** i
        flat_w += [_pack_conv_weight(blk["w1"], cpad), _pack_bias(blk["b1"], cpad),
                   _pack_conv_weight(blk["w2"], cpad), _pack_bias(blk["b2"], cpad)]
        has_ds = blk["wd"] is not None
        if has_ds:
            cin, cout = blk["wd"].shape
            wd = jnp.zeros((cpad, cpad), jnp.float32).at[:cin, :cout].set(blk["wd"])
            flat_w += [wd, _pack_bias(blk["bd"], cpad)]
        meta.append((d, has_ds))

    c_last = params["lin_w"].shape[0]
    lin_w = jnp.zeros((cpad, 1), jnp.float32).at[:c_last, :].set(params["lin_w"])
    lin_b = params["lin_b"]

    kernel = _make_fused_tcn_kernel(tuple(meta), B, L, kernel_size, cpad)
    n_inputs = 1 + len(flat_w) + 2
    out = pl.pallas_call(
        kernel,
        out_shape=jax.ShapeDtypeStruct((B, 1), jnp.float32),
        in_specs=[pl.BlockSpec(memory_space=pltpu.MemorySpace.VMEM)] * n_inputs,
        out_specs=pl.BlockSpec(memory_space=pltpu.MemorySpace.VMEM),
        scratch_shapes=[pltpu.VMEM((B, L, kernel_size * cpad), jnp.float32)],
    )(xp, *flat_w, lin_w, lin_b)
    return out[:, 0]


# ----------------------------------------------------------------------------
# Deterministic parameter construction (synthetic; mirrors module shapes).
# weight_norm is a parameter reparameterization -> folded into effective weights here.
# ----------------------------------------------------------------------------
def _weight_norm_conv_params(key, cin, cout, K):
    kv, kg, kb = jax.random.split(key, 3)
    v = 0.01 * jax.random.normal(kv, (cout, cin, K), jnp.float32)   # like .normal_(0, 0.01)
    g = 0.5 + jax.random.uniform(kg, (cout,), jnp.float32)
    norm = jnp.sqrt(jnp.sum(v * v, axis=(1, 2), keepdims=True)) + 1e-12
    w = g[:, None, None] * v / norm                                  # (Cout, Cin, K)
    bound = 1.0 / (cin * K) ** 0.5
    b = jax.random.uniform(kb, (cout,), jnp.float32, -bound, bound)
    return jnp.transpose(w, (2, 1, 0)), b.reshape(1, cout)           # (K, Cin, Cout), (1, Cout)


def init_tcn_params(key, num_channels, kernel_size, num_inputs=1):
    blocks = []
    keys = jax.random.split(key, len(num_channels) + 1)
    cin = num_inputs
    for i, cout in enumerate(num_channels):
        k1, k2, k3 = jax.random.split(keys[i], 3)
        w1, b1 = _weight_norm_conv_params(k1, cin, cout, kernel_size)
        w2, b2 = _weight_norm_conv_params(k2, cout, cout, kernel_size)
        if cin != cout:                      # downsample 1x1 conv exists
            kd_w, kd_b = jax.random.split(k3)
            wd_oiw = 0.01 * jax.random.normal(kd_w, (cout, cin, 1), jnp.float32)
            wd = jnp.transpose(wd_oiw[:, :, 0], (1, 0))              # (Cin, Cout)
            bound = 1.0 / cin ** 0.5
            bd = jax.random.uniform(kd_b, (1, cout), jnp.float32, -bound, bound)
        else:                                # identity residual: no params at all
            wd, bd = None, None
        blocks.append(dict(w1=w1, b1=b1, w2=w2, b2=b2, wd=wd, bd=bd))
        cin = cout
    k_lw, k_lb = jax.random.split(keys[-1])
    lin_w = (0.01 * jax.random.normal(k_lw, (1, num_channels[-1]), jnp.float32)).T  # (C, 1)
    bound = 1.0 / num_channels[-1] ** 0.5
    lin_b = jax.random.uniform(k_lb, (1, 1), jnp.float32, -bound, bound)
    return {"blocks": blocks, "lin_w": lin_w, "lin_b": lin_b}


# ----------------------------------------------------------------------------
# Pure-JAX reference (mirrors the PyTorch NCW forward) for the correctness check.
# ----------------------------------------------------------------------------
def ref_forward(x, params, kernel_size):
    h = x[:, None, :]                                                # (B, 1, L) NCW
    for i, blk in enumerate(params["blocks"]):
        d = 2 ** i
        P = (kernel_size - 1) * d

        def conv(inp, w_klc, b, dil, pad):
            w = jnp.transpose(w_klc, (2, 1, 0))                      # (Cout, Cin, K) OIW
            out = lax.conv_general_dilated(
                inp, w, window_strides=(1,), padding=[(pad, pad)],
                rhs_dilation=(dil,), dimension_numbers=("NCW", "OIW", "NCW"))
            out = out[:, :, :out.shape[2] - pad]                     # chomp
            return out + b.reshape(1, -1, 1)

        o = jax.nn.relu(conv(h, blk["w1"], blk["b1"], d, P))
        o = jax.nn.relu(conv(o, blk["w2"], blk["b2"], d, P))
        if blk["wd"] is not None:
            res = jnp.einsum("bcl,co->bol", h, blk["wd"]) + blk["bd"].reshape(1, -1, 1)
        else:
            res = h
        h = jax.nn.relu(o + res)
    pooled = jnp.mean(h, axis=2)                                     # (B, C)
    return (pooled @ params["lin_w"] + params["lin_b"])[:, 0]


# ----------------------------------------------------------------------------
if __name__ == "__main__":
    num_channels = [8, 16, 16]      # exercises both downsample and identity residuals
    kernel_size = 3
    B, L = 2, 16

    key = jax.random.PRNGKey(0)
    k_x, k_p = jax.random.split(key)
    x = jax.random.normal(k_x, (B, L), jnp.float32)
    params = init_tcn_params(k_p, num_channels, kernel_size)

    out = jax.block_until_ready(tcn_forward(x, params, kernel_size))
    ref = ref_forward(x, params, kernel_size)

    assert out.shape == (B,), out.shape
    assert jnp.allclose(out, ref, atol=1e-4, rtol=1e-4), (out, ref)
    print("KERNEL_OK")
</pallas_src>

<mosaic_0001>
module attributes {stable_mosaic.version = 11 : i64} {
  func.func @kernel(%arg0: memref<2x16x128xf32, #tpu.memory_space<vmem>>, %arg1: memref<384x128xf32, #tpu.memory_space<vmem>>, %arg2: memref<1x128xf32, #tpu.memory_space<vmem>>, %arg3: memref<384x128xf32, #tpu.memory_space<vmem>>, %arg4: memref<1x128xf32, #tpu.memory_space<vmem>>, %arg5: memref<128x128xf32, #tpu.memory_space<vmem>>, %arg6: memref<1x128xf32, #tpu.memory_space<vmem>>, %arg7: memref<384x128xf32, #tpu.memory_space<vmem>>, %arg8: memref<1x128xf32, #tpu.memory_space<vmem>>, %arg9: memref<384x128xf32, #tpu.memory_space<vmem>>, %arg10: memref<1x128xf32, #tpu.memory_space<vmem>>, %arg11: memref<128x128xf32, #tpu.memory_space<vmem>>, %arg12: memref<1x128xf32, #tpu.memory_space<vmem>>, %arg13: memref<384x128xf32, #tpu.memory_space<vmem>>, %arg14: memref<1x128xf32, #tpu.memory_space<vmem>>, %arg15: memref<384x128xf32, #tpu.memory_space<vmem>>, %arg16: memref<1x128xf32, #tpu.memory_space<vmem>>, %arg17: memref<128x1xf32, #tpu.memory_space<vmem>>, %arg18: memref<1x1xf32, #tpu.memory_space<vmem>>, %arg19: memref<2x1xf32, #tpu.memory_space<vmem>>, %arg20: memref<2x16x384xf32, #tpu.memory_space<vmem>>) attributes {dimension_semantics = [], scalar_prefetch = 0 : i64, scratch_operands = 1 : i64, tpu.core_type = #tpu.core_type<tc>} {
    %c0 = arith.constant 0 : index
    %c0_0 = arith.constant 0 : index
    %c0_1 = arith.constant 0 : index
    %0 = vector.load %arg0[%c0, %c0_0, %c0_1] : memref<2x16x128xf32, #tpu.memory_space<vmem>>, vector<2x16x128xf32>
    %cst = arith.constant 0.000000e+00 : f32
    %1 = vector.broadcast %cst : f32 to vector<2x2x128xf32>
    %c0_2 = arith.constant 0 : index
    %c0_3 = arith.constant 0 : index
    %c0_4 = arith.constant 0 : index
    %2 = vector.load %arg20[%c0_2, %c0_3, %c0_4] : memref<2x16x384xf32, #tpu.memory_space<vmem>>, vector<2x2x128xf32>
    tpu.vector_store %arg20[%c0_2, %c0_3, %c0_4], %1 {strides = array<i32>} : memref<2x16x384xf32, #tpu.memory_space<vmem>>, vector<2x2x128xf32>,
    %3 = vector.extract_strided_slice %0 {offsets = [0, 0, 0], sizes = [2, 14, 128], strides = [1, 1, 1]} : vector<2x16x128xf32> to vector<2x14x128xf32>
    %c0_5 = arith.constant 0 : index
    %c2 = arith.constant 2 : index
    %c0_6 = arith.constant 0 : index
    %4 = vector.load %arg20[%c0_5, %c2, %c0_6] : memref<2x16x384xf32, #tpu.memory_space<vmem>>, vector<2x14x128xf32>
    tpu.vector_store %arg20[%c0_5, %c2, %c0_6], %3 {strides = array<i32>} : memref<2x16x384xf32, #tpu.memory_space<vmem>>, vector<2x14x128xf32>,
    %cst_7 = arith.constant 0.000000e+00 : f32
    %5 = vector.broadcast %cst_7 : f32 to vector<2x1x128xf32>
    %c0_8 = arith.constant 0 : index
    %c0_9 = arith.constant 0 : index
    %c128 = arith.constant 128 : index
    %6 = vector.load %arg20[%c0_8, %c0_9, %c128] : memref<2x16x384xf32, #tpu.memory_space<vmem>>, vector<2x1x128xf32>
    tpu.vector_store %arg20[%c0_8, %c0_9, %c128], %5 {strides = array<i32>} : memref<2x16x384xf32, #tpu.memory_space<vmem>>, vector<2x1x128xf32>,
    %7 = vector.extract_strided_slice %0 {offsets = [0, 0, 0], sizes = [2, 15, 128], strides = [1, 1, 1]} : vector<2x16x128xf32> to vector<2x15x128xf32>
    %c0_10 = arith.constant 0 : index
    %c1 = arith.constant 1 : index
    %c128_11 = arith.constant 128 : index
    %8 = vector.load %arg20[%c0_10, %c1, %c128_11] : memref<2x16x384xf32, #tpu.memory_space<vmem>>, vector<2x15x128xf32>
    tpu.vector_store %arg20[%c0_10, %c1, %c128_11], %7 {strides = array<i32>} : memref<2x16x384xf32, #tpu.memory_space<vmem>>, vector<2x15x128xf32>,
    %c0_12 = arith.constant 0 : index
    %c0_13 = arith.constant 0 : index
    %c256 = arith.constant 256 : index
    %9 = vector.load %arg20[%c0_12, %c0_13, %c256] : memref<2x16x384xf32, #tpu.memory_space<vmem>>, vector<2x16x128xf32>
    tpu.vector_store %arg20[%c0_12, %c0_13, %c256], %0 {strides = array<i32>} : memref<2x16x384xf32, #tpu.memory_space<vmem>>, vector<2x16x128xf32>,
    %c0_14 = arith.constant 0 : index
    %c0_15 = arith.constant 0 : index
    %c0_16 = arith.constant 0 : index
    %10 = vector.load %arg20[%c0_14, %c0_15, %c0_16] : memref<2x16x384xf32, #tpu.memory_space<vmem>>, vector<2x16x384xf32>
    %11 = vector.shape_cast %10 : vector<2x16x384xf32> to vector<32x384xf32>
    %c0_17 = arith.constant 0 : index
    %c0_18 = arith.constant 0 : index
    %12 = vector.load %arg1[%c0_17, %c0_18] : memref<384x128xf32, #tpu.memory_space<vmem>>, vector<384x128xf32>
    %cst_19 = arith.constant dense<0.000000e+00> : vector<32x128xf32>
    %13 = tpu.matmul %11, %12, %cst_19 {dimension_numbers = #tpu.dot_dimension_numbers<[1], [0], [0], [1], [0, 0, 1, 1], [], []>} : vector<32x384xf32>, vector<384x128xf32>, vector<32x128xf32> -> vector<32x128xf32>
    %14 = vector.shape_cast %13 : vector<32x128xf32> to vector<2x16x128xf32>
    %c0_20 = arith.constant 0 : index
    %c0_21 = arith.constant 0 : index
    %15 = vector.load %arg2[%c0_20, %c0_21] : memref<1x128xf32, #tpu.memory_space<vmem>>, vector<1x128xf32>
    %16 = vector.shape_cast %15 : vector<1x128xf32> to vector<1x1x128xf32>
    %17 = vector.broadcast %16 : vector<1x1x128xf32> to vector<2x16x128xf32>
    %18 = arith.addf %14, %17 : vector<2x16x128xf32>
    %cst_22 = arith.constant 0.000000e+00 : f32
    %19 = vector.broadcast %cst_22 : f32 to vector<2x16x128xf32>
    %20 = arith.maximumf %18, %19 : vector<2x16x128xf32>
    %cst_23 = arith.constant 0.000000e+00 : f32
    %21 = vector.broadcast %cst_23 : f32 to vector<2x2x128xf32>
    %c0_24 = arith.constant 0 : index
    %c0_25 = arith.constant 0 : index
    %c0_26 = arith.constant 0 : index
    %22 = vector.load %arg20[%c0_24, %c0_25, %c0_26] : memref<2x16x384xf32, #tpu.memory_space<vmem>>, vector<2x2x128xf32>
    tpu.vector_store %arg20[%c0_24, %c0_25, %c0_26], %21 {strides = array<i32>} : memref<2x16x384xf32, #tpu.memory_space<vmem>>, vector<2x2x128xf32>,
    %23 = vector.extract_strided_slice %20 {offsets = [0, 0, 0], sizes = [2, 14, 128], strides = [1, 1, 1]} : vector<2x16x128xf32> to vector<2x14x128xf32>
    %c0_27 = arith.constant 0 : index
    %c2_28 = arith.constant 2 : index
    %c0_29 = arith.constant 0 : index
    %24 = vector.load %arg20[%c0_27, %c2_28, %c0_29] : memref<2x16x384xf32, #tpu.memory_space<vmem>>, vector<2x14x128xf32>
    tpu.vector_store %arg20[%c0_27, %c2_28, %c0_29], %23 {strides = array<i32>} : memref<2x16x384xf32, #tpu.memory_space<vmem>>, vector<2x14x128xf32>,
    %cst_30 = arith.constant 0.000000e+00 : f32
    %25 = vector.broadcast %cst_30 : f32 to vector<2x1x128xf32>
    %c0_31 = arith.constant 0 : index
    %c0_32 = arith.constant 0 : index
    %c128_33 = arith.constant 128 : index
    %26 = vector.load %arg20[%c0_31, %c0_32, %c128_33] : memref<2x16x384xf32, #tpu.memory_space<vmem>>, vector<2x1x128xf32>
    tpu.vector_store %arg20[%c0_31, %c0_32, %c128_33], %25 {strides = array<i32>} : memref<2x16x384xf32, #tpu.memory_space<vmem>>, vector<2x1x128xf32>,
    %27 = vector.extract_strided_slice %20 {offsets = [0, 0, 0], sizes = [2, 15, 128], strides = [1, 1, 1]} : vector<2x16x128xf32> to vector<2x15x128xf32>
    %c0_34 = arith.constant 0 : index
    %c1_35 = arith.constant 1 : index
    %c128_36 = arith.constant 128 : index
    %28 = vector.load %arg20[%c0_34, %c1_35, %c128_36] : memref<2x16x384xf32, #tpu.memory_space<vmem>>, vector<2x15x128xf32>
    tpu.vector_store %arg20[%c0_34, %c1_35, %c128_36], %27 {strides = array<i32>} : memref<2x16x384xf32, #tpu.memory_space<vmem>>, vector<2x15x128xf32>,
    %c0_37 = arith.constant 0 : index
    %c0_38 = arith.constant 0 : index
    %c256_39 = arith.constant 256 : index
    %29 = vector.load %arg20[%c0_37, %c0_38, %c256_39] : memref<2x16x384xf32, #tpu.memory_space<vmem>>, vector<2x16x128xf32>
    tpu.vector_store %arg20[%c0_37, %c0_38, %c256_39], %20 {strides = array<i32>} : memref<2x16x384xf32, #tpu.memory_space<vmem>>, vector<2x16x128xf32>,
    %c0_40 = arith.constant 0 : index
    %c0_41 = arith.constant 0 : index
    %c0_42 = arith.constant 0 : index
    %30 = vector.load %arg20[%c0_40, %c0_41, %c0_42] : memref<2x16x384xf32, #tpu.memory_space<vmem>>, vector<2x16x384xf32>
    %31 = vector.shape_cast %30 : vector<2x16x384xf32> to vector<32x384xf32>
    %c0_43 = arith.constant 0 : index
    %c0_44 = arith.constant 0 : index
    %32 = vector.load %arg3[%c0_43, %c0_44] : memref<384x128xf32, #tpu.memory_space<vmem>>, vector<384x128xf32>
    %cst_45 = arith.constant dense<0.000000e+00> : vector<32x128xf32>
    %33 = tpu.matmul %31, %32, %cst_45 {dimension_numbers = #tpu.dot_dimension_numbers<[1], [0], [0], [1], [0, 0, 1, 1], [], []>} : vector<32x384xf32>, vector<384x128xf32>, vector<32x128xf32> -> vector<32x128xf32>
    %34 = vector.shape_cast %33 : vector<32x128xf32> to vector<2x16x128xf32>
    %c0_46 = arith.constant 0 : index
    %c0_47 = arith.constant 0 : index
    %35 = vector.load %arg4[%c0_46, %c0_47] : memref<1x128xf32, #tpu.memory_space<vmem>>, vector<1x128xf32>
    %36 = vector.shape_cast %35 : vector<1x128xf32> to vector<1x1x128xf32>
    %37 = vector.broadcast %36 : vector<1x1x128xf32> to vector<2x16x128xf32>
    %38 = arith.addf %34, %37 : vector<2x16x128xf32>
    %cst_48 = arith.constant 0.000000e+00 : f32
    %39 = vector.broadcast %cst_48 : f32 to vector<2x16x128xf32>
    %40 = arith.maximumf %38, %39 : vector<2x16x128xf32>
    %41 = vector.shape_cast %0 : vector<2x16x128xf32> to vector<32x128xf32>
    %c0_49 = arith.constant 0 : index
    %c0_50 = arith.constant 0 : index
    %42 = vector.load %arg5[%c0_49, %c0_50] : memref<128x128xf32, #tpu.memory_space<vmem>>, vector<128x128xf32>
    %cst_51 = arith.constant dense<0.000000e+00> : vector<32x128xf32>
    %43 = tpu.matmul %41, %42, %cst_51 {dimension_numbers = #tpu.dot_dimension_numbers<[1], [0], [0], [1], [0, 0, 1, 1], [], []>} : vector<32x128xf32>, vector<128x128xf32>, vector<32x128xf32> -> vector<32x128xf32>
    %44 = vector.shape_cast %43 : vector<32x128xf32> to vector<2x16x128xf32>
    %c0_52 = arith.constant 0 : index
    %c0_53 = arith.constant 0 : index
    %45 = vector.load %arg6[%c0_52, %c0_53] : memref<1x128xf32, #tpu.memory_space<vmem>>, vector<1x128xf32>
    %46 = vector.shape_cast %45 : vector<1x128xf32> to vector<1x1x128xf32>
    %47 = vector.broadcast %46 : vector<1x1x128xf32> to vector<2x16x128xf32>
    %48 = arith.addf %44, %47 : vector<2x16x128xf32>
    %49 = arith.addf %40, %48 : vector<2x16x128xf32>
    %cst_54 = arith.constant 0.000000e+00 : f32
    %50 = vector.broadcast %cst_54 : f32 to vector<2x16x128xf32>
    %51 = arith.maximumf %49, %50 : vector<2x16x128xf32>
    %cst_55 = arith.constant 0.000000e+00 : f32
    %52 = vector.broadcast %cst_55 : f32 to vector<2x4x128xf32>
    %c0_56 = arith.constant 0 : index
    %c0_57 = arith.constant 0 : index
    %c0_58 = arith.constant 0 : index
    %53 = vector.load %arg20[%c0_56, %c0_57, %c0_58] : memref<2x16x384xf32, #tpu.memory_space<vmem>>, vector<2x4x128xf32>
    tpu.vector_store %arg20[%c0_56, %c0_57, %c0_58], %52 {strides = array<i32>} : memref<2x16x384xf32, #tpu.memory_space<vmem>>, vector<2x4x128xf32>,
    %54 = vector.extract_strided_slice %51 {offsets = [0, 0, 0], sizes = [2, 12, 128], strides = [1, 1, 1]} : vector<2x16x128xf32> to vector<2x12x128xf32>
    %c0_59 = arith.constant 0 : index
    %c4 = arith.constant 4 : index
    %c0_60 = arith.constant 0 : index
    %55 = vector.load %arg20[%c0_59, %c4, %c0_60] : memref<2x16x384xf32, #tpu.memory_space<vmem>>, vector<2x12x128xf32>
    tpu.vector_store %arg20[%c0_59, %c4, %c0_60], %54 {strides = array<i32>} : memref<2x16x384xf32, #tpu.memory_space<vmem>>, vector<2x12x128xf32>,
    %cst_61 = arith.constant 0.000000e+00 : f32
    %56 = vector.broadcast %cst_61 : f32 to vector<2x2x128xf32>
    %c0_62 = arith.constant 0 : index
    %c0_63 = arith.constant 0 : index
    %c128_64 = arith.constant 128 : index
    %57 = vector.load %arg20[%c0_62, %c0_63, %c128_64] : memref<2x16x384xf32, #tpu.memory_space<vmem>>, vector<2x2x128xf32>
    tpu.vector_store %arg20[%c0_62, %c0_63, %c128_64], %56 {strides = array<i32>} : memref<2x16x384xf32, #tpu.memory_space<vmem>>, vector<2x2x128xf32>,
    %58 = vector.extract_strided_slice %51 {offsets = [0, 0, 0], sizes = [2, 14, 128], strides = [1, 1, 1]} : vector<2x16x128xf32> to vector<2x14x128xf32>
    %c0_65 = arith.constant 0 : index
    %c2_66 = arith.constant 2 : index
    %c128_67 = arith.constant 128 : index
    %59 = vector.load %arg20[%c0_65, %c2_66, %c128_67] : memref<2x16x384xf32, #tpu.memory_space<vmem>>, vector<2x14x128xf32>
    tpu.vector_store %arg20[%c0_65, %c2_66, %c128_67], %58 {strides = array<i32>} : memref<2x16x384xf32, #tpu.memory_space<vmem>>, vector<2x14x128xf32>,
    %c0_68 = arith.constant 0 : index
    %c0_69 = arith.constant 0 : index
    %c256_70 = arith.constant 256 : index
    %60 = vector.load %arg20[%c0_68, %c0_69, %c256_70] : memref<2x16x384xf32, #tpu.memory_space<vmem>>, vector<2x16x128xf32>
    tpu.vector_store %arg20[%c0_68, %c0_69, %c256_70], %51 {strides = array<i32>} : memref<2x16x384xf32, #tpu.memory_space<vmem>>, vector<2x16x128xf32>,
    %c0_71 = arith.constant 0 : index
    %c0_72 = arith.constant 0 : index
    %c0_73 = arith.constant 0 : index
    %61 = vector.load %arg20[%c0_71, %c0_72, %c0_73] : memref<2x16x384xf32, #tpu.memory_space<vmem>>, vector<2x16x384xf32>
    %62 = vector.shape_cast %61 : vector<2x16x384xf32> to vector<32x384xf32>
    %c0_74 = arith.constant 0 : index
    %c0_75 = arith.constant 0 : index
    %63 = vector.load %arg7[%c0_74, %c0_75] : memref<384x128xf32, #tpu.memory_space<vmem>>, vector<384x128xf32>
    %cst_76 = arith.constant dense<0.000000e+00> : vector<32x128xf32>
    %64 = tpu.matmul %62, %63, %cst_76 {dimension_numbers = #tpu.dot_dimension_numbers<[1], [0], [0], [1], [0, 0, 1, 1], [], []>} : vector<32x384xf32>, vector<384x128xf32>, vector<32x128xf32> -> vector<32x128xf32>
    %65 = vector.shape_cast %64 : vector<32x128xf32> to vector<2x16x128xf32>
    %c0_77 = arith.constant 0 : index
    %c0_78 = arith.constant 0 : index
    %66 = vector.load %arg8[%c0_77, %c0_78] : memref<1x128xf32, #tpu.memory_space<vmem>>, vector<1x128xf32>
    %67 = vector.shape_cast %66 : vector<1x128xf32> to vector<1x1x128xf32>
    %68 = vector.broadcast %67 : vector<1x1x128xf32> to vector<2x16x128xf32>
    %69 = arith.addf %65, %68 : vector<2x16x128xf32>
    %cst_79 = arith.constant 0.000000e+00 : f32
    %70 = vector.broadcast %cst_79 : f32 to vector<2x16x128xf32>
    %71 = arith.maximumf %69, %70 : vector<2x16x128xf32>
    %cst_80 = arith.constant 0.000000e+00 : f32
    %72 = vector.broadcast %cst_80 : f32 to vector<2x4x128xf32>
    %c0_81 = arith.constant 0 : index
    %c0_82 = arith.constant 0 : index
    %c0_83 = arith.constant 0 : index
    %73 = vector.load %arg20[%c0_81, %c0_82, %c0_83] : memref<2x16x384xf32, #tpu.memory_space<vmem>>, vector<2x4x128xf32>
    tpu.vector_store %arg20[%c0_81, %c0_82, %c0_83], %72 {strides = array<i32>} : memref<2x16x384xf32, #tpu.memory_space<vmem>>, vector<2x4x128xf32>,
    %74 = vector.extract_strided_slice %71 {offsets = [0, 0, 0], sizes = [2, 12, 128], strides = [1, 1, 1]} : vector<2x16x128xf32> to vector<2x12x128xf32>
    %c0_84 = arith.constant 0 : index
    %c4_85 = arith.constant 4 : index
    %c0_86 = arith.constant 0 : index
    %75 = vector.load %arg20[%c0_84, %c4_85, %c0_86] : memref<2x16x384xf32, #tpu.memory_space<vmem>>, vector<2x12x128xf32>
    tpu.vector_store %arg20[%c0_84, %c4_85, %c0_86], %74 {strides = array<i32>} : memref<2x16x384xf32, #tpu.memory_space<vmem>>, vector<2x12x128xf32>,
    %cst_87 = arith.constant 0.000000e+00 : f32
    %76 = vector.broadcast %cst_87 : f32 to vector<2x2x128xf32>
    %c0_88 = arith.constant 0 : index
    %c0_89 = arith.constant 0 : index
    %c128_90 = arith.constant 128 : index
    %77 = vector.load %arg20[%c0_88, %c0_89, %c128_90] : memref<2x16x384xf32, #tpu.memory_space<vmem>>, vector<2x2x128xf32>
    tpu.vector_store %arg20[%c0_88, %c0_89, %c128_90], %76 {strides = array<i32>} : memref<2x16x384xf32, #tpu.memory_space<vmem>>, vector<2x2x128xf32>,
    %78 = vector.extract_strided_slice %71 {offsets = [0, 0, 0], sizes = [2, 14, 128], strides = [1, 1, 1]} : vector<2x16x128xf32> to vector<2x14x128xf32>
    %c0_91 = arith.constant 0 : index
    %c2_92 = arith.constant 2 : index
    %c128_93 = arith.constant 128 : index
    %79 = vector.load %arg20[%c0_91, %c2_92, %c128_93] : memref<2x16x384xf32, #tpu.memory_space<vmem>>, vector<2x14x128xf32>
    tpu.vector_store %arg20[%c0_91, %c2_92, %c128_93], %78 {strides = array<i32>} : memref<2x16x384xf32, #tpu.memory_space<vmem>>, vector<2x14x128xf32>,
    %c0_94 = arith.constant 0 : index
    %c0_95 = arith.constant 0 : index
    %c256_96 = arith.constant 256 : index
    %80 = vector.load %arg20[%c0_94, %c0_95, %c256_96] : memref<2x16x384xf32, #tpu.memory_space<vmem>>, vector<2x16x128xf32>
    tpu.vector_store %arg20[%c0_94, %c0_95, %c256_96], %71 {strides = array<i32>} : memref<2x16x384xf32, #tpu.memory_space<vmem>>, vector<2x16x128xf32>,
    %c0_97 = arith.constant 0 : index
    %c0_98 = arith.constant 0 : index
    %c0_99 = arith.constant 0 : index
    %81 = vector.load %arg20[%c0_97, %c0_98, %c0_99] : memref<2x16x384xf32, #tpu.memory_space<vmem>>, vector<2x16x384xf32>
    %82 = vector.shape_cast %81 : vector<2x16x384xf32> to vector<32x384xf32>
    %c0_100 = arith.constant 0 : index
    %c0_101 = arith.constant 0 : index
    %83 = vector.load %arg9[%c0_100, %c0_101] : memref<384x128xf32, #tpu.memory_space<vmem>>, vector<384x128xf32>
    %cst_102 = arith.constant dense<0.000000e+00> : vector<32x128xf32>
    %84 = tpu.matmul %82, %83, %cst_102 {dimension_numbers = #tpu.dot_dimension_numbers<[1], [0], [0], [1], [0, 0, 1, 1], [], []>} : vector<32x384xf32>, vector<384x128xf32>, vector<32x128xf32> -> vector<32x128xf32>
    %85 = vector.shape_cast %84 : vector<32x128xf32> to vector<2x16x128xf32>
    %c0_103 = arith.constant 0 : index
    %c0_104 = arith.constant 0 : index
    %86 = vector.load %arg10[%c0_103, %c0_104] : memref<1x128xf32, #tpu.memory_space<vmem>>, vector<1x128xf32>
    %87 = vector.shape_cast %86 : vector<1x128xf32> to vector<1x1x128xf32>
    %88 = vector.broadcast %87 : vector<1x1x128xf32> to vector<2x16x128xf32>
    %89 = arith.addf %85, %88 : vector<2x16x128xf32>
    %cst_105 = arith.constant 0.000000e+00 : f32
    %90 = vector.broadcast %cst_105 : f32 to vector<2x16x128xf32>
    %91 = arith.maximumf %89, %90 : vector<2x16x128xf32>
    %92 = vector.shape_cast %51 : vector<2x16x128xf32> to vector<32x128xf32>
    %c0_106 = arith.constant 0 : index
    %c0_107 = arith.constant 0 : index
    %93 = vector.load %arg11[%c0_106, %c0_107] : memref<128x128xf32, #tpu.memory_space<vmem>>, vector<128x128xf32>
    %cst_108 = arith.constant dense<0.000000e+00> : vector<32x128xf32>
    %94 = tpu.matmul %92, %93, %cst_108 {dimension_numbers = #tpu.dot_dimension_numbers<[1], [0], [0], [1], [0, 0, 1, 1], [], []>} : vector<32x128xf32>, vector<128x128xf32>, vector<32x128xf32> -> vector<32x128xf32>
    %95 = vector.shape_cast %94 : vector<32x128xf32> to vector<2x16x128xf32>
    %c0_109 = arith.constant 0 : index
    %c0_110 = arith.constant 0 : index
    %96 = vector.load %arg12[%c0_109, %c0_110] : memref<1x128xf32, #tpu.memory_space<vmem>>, vector<1x128xf32>
    %97 = vector.shape_cast %96 : vector<1x128xf32> to vector<1x1x128xf32>
    %98 = vector.broadcast %97 : vector<1x1x128xf32> to vector<2x16x128xf32>
    %99 = arith.addf %95, %98 : vector<2x16x128xf32>
    %100 = arith.addf %91, %99 : vector<2x16x128xf32>
    %cst_111 = arith.constant 0.000000e+00 : f32
    %101 = vector.broadcast %cst_111 : f32 to vector<2x16x128xf32>
    %102 = arith.maximumf %100, %101 : vector<2x16x128xf32>
    %cst_112 = arith.constant 0.000000e+00 : f32
    %103 = vector.broadcast %cst_112 : f32 to vector<2x8x128xf32>
    %c0_113 = arith.constant 0 : index
    %c0_114 = arith.constant 0 : index
    %c0_115 = arith.constant 0 : index
    %104 = vector.load %arg20[%c0_113, %c0_114, %c0_115] : memref<2x16x384xf32, #tpu.memory_space<vmem>>, vector<2x8x128xf32>
    tpu.vector_store %arg20[%c0_113, %c0_114, %c0_115], %103 {strides = array<i32>} : memref<2x16x384xf32, #tpu.memory_space<vmem>>, vector<2x8x128xf32>,
    %105 = vector.extract_strided_slice %102 {offsets = [0, 0, 0], sizes = [2, 8, 128], strides = [1, 1, 1]} : vector<2x16x128xf32> to vector<2x8x128xf32>
    %c0_116 = arith.constant 0 : index
    %c8 = arith.constant 8 : index
    %c0_117 = arith.constant 0 : index
    %106 = vector.load %arg20[%c0_116, %c8, %c0_117] : memref<2x16x384xf32, #tpu.memory_space<vmem>>, vector<2x8x128xf32>
    tpu.vector_store %arg20[%c0_116, %c8, %c0_117], %105 {strides = array<i32>} : memref<2x16x384xf32, #tpu.memory_space<vmem>>, vector<2x8x128xf32>,
    %cst_118 = arith.constant 0.000000e+00 : f32
    %107 = vector.broadcast %cst_118 : f32 to vector<2x4x128xf32>
    %c0_119 = arith.constant 0 : index
    %c0_120 = arith.constant 0 : index
    %c128_121 = arith.constant 128 : index
    %108 = vector.load %arg20[%c0_119, %c0_120, %c128_121] : memref<2x16x384xf32, #tpu.memory_space<vmem>>, vector<2x4x128xf32>
    tpu.vector_store %arg20[%c0_119, %c0_120, %c128_121], %107 {strides = array<i32>} : memref<2x16x384xf32, #tpu.memory_space<vmem>>, vector<2x4x128xf32>,
    %109 = vector.extract_strided_slice %102 {offsets = [0, 0, 0], sizes = [2, 12, 128], strides = [1, 1, 1]} : vector<2x16x128xf32> to vector<2x12x128xf32>
    %c0_122 = arith.constant 0 : index
    %c4_123 = arith.constant 4 : index
    %c128_124 = arith.constant 128 : index
    %110 = vector.load %arg20[%c0_122, %c4_123, %c128_124] : memref<2x16x384xf32, #tpu.memory_space<vmem>>, vector<2x12x128xf32>
    tpu.vector_store %arg20[%c0_122, %c4_123, %c128_124], %109 {strides = array<i32>} : memref<2x16x384xf32, #tpu.memory_space<vmem>>, vector<2x12x128xf32>,
    %c0_125 = arith.constant 0 : index
    %c0_126 = arith.constant 0 : index
    %c256_127 = arith.constant 256 : index
    %111 = vector.load %arg20[%c0_125, %c0_126, %c256_127] : memref<2x16x384xf32, #tpu.memory_space<vmem>>, vector<2x16x128xf32>
    tpu.vector_store %arg20[%c0_125, %c0_126, %c256_127], %102 {strides = array<i32>} : memref<2x16x384xf32, #tpu.memory_space<vmem>>, vector<2x16x128xf32>,
    %c0_128 = arith.constant 0 : index
    %c0_129 = arith.constant 0 : index
    %c0_130 = arith.constant 0 : index
    %112 = vector.load %arg20[%c0_128, %c0_129, %c0_130] : memref<2x16x384xf32, #tpu.memory_space<vmem>>, vector<2x16x384xf32>
    %113 = vector.shape_cast %112 : vector<2x16x384xf32> to vector<32x384xf32>
    %c0_131 = arith.constant 0 : index
    %c0_132 = arith.constant 0 : index
    %114 = vector.load %arg13[%c0_131, %c0_132] : memref<384x128xf32, #tpu.memory_space<vmem>>, vector<384x128xf32>
    %cst_133 = arith.constant dense<0.000000e+00> : vector<32x128xf32>
    %115 = tpu.matmul %113, %114, %cst_133 {dimension_numbers = #tpu.dot_dimension_numbers<[1], [0], [0], [1], [0, 0, 1, 1], [], []>} : vector<32x384xf32>, vector<384x128xf32>, vector<32x128xf32> -> vector<32x128xf32>
    %116 = vector.shape_cast %115 : vector<32x128xf32> to vector<2x16x128xf32>
    %c0_134 = arith.constant 0 : index
    %c0_135 = arith.constant 0 : index
    %117 = vector.load %arg14[%c0_134, %c0_135] : memref<1x128xf32, #tpu.memory_space<vmem>>, vector<1x128xf32>
    %118 = vector.shape_cast %117 : vector<1x128xf32> to vector<1x1x128xf32>
    %119 = vector.broadcast %118 : vector<1x1x128xf32> to vector<2x16x128xf32>
    %120 = arith.addf %116, %119 : vector<2x16x128xf32>
    %cst_136 = arith.constant 0.000000e+00 : f32
    %121 = vector.broadcast %cst_136 : f32 to vector<2x16x128xf32>
    %122 = arith.maximumf %120, %121 : vector<2x16x128xf32>
    %cst_137 = arith.constant 0.000000e+00 : f32
    %123 = vector.broadcast %cst_137 : f32 to vector<2x8x128xf32>
    %c0_138 = arith.constant 0 : index
    %c0_139 = arith.constant 0 : index
    %c0_140 = arith.constant 0 : index
    %124 = vector.load %arg20[%c0_138, %c0_139, %c0_140] : memref<2x16x384xf32, #tpu.memory_space<vmem>>, vector<2x8x128xf32>
    tpu.vector_store %arg20[%c0_138, %c0_139, %c0_140], %123 {strides = array<i32>} : memref<2x16x384xf32, #tpu.memory_space<vmem>>, vector<2x8x128xf32>,
    %125 = vector.extract_strided_slice %122 {offsets = [0, 0, 0], sizes = [2, 8, 128], strides = [1, 1, 1]} : vector<2x16x128xf32> to vector<2x8x128xf32>
    %c0_141 = arith.constant 0 : index
    %c8_142 = arith.constant 8 : index
    %c0_143 = arith.constant 0 : index
    %126 = vector.load %arg20[%c0_141, %c8_142, %c0_143] : memref<2x16x384xf32, #tpu.memory_space<vmem>>, vector<2x8x128xf32>
    tpu.vector_store %arg20[%c0_141, %c8_142, %c0_143], %125 {strides = array<i32>} : memref<2x16x384xf32, #tpu.memory_space<vmem>>, vector<2x8x128xf32>,
    %cst_144 = arith.constant 0.000000e+00 : f32
    %127 = vector.broadcast %cst_144 : f32 to vector<2x4x128xf32>
    %c0_145 = arith.constant 0 : index
    %c0_146 = arith.constant 0 : index
    %c128_147 = arith.constant 128 : index
    %128 = vector.load %arg20[%c0_145, %c0_146, %c128_147] : memref<2x16x384xf32, #tpu.memory_space<vmem>>, vector<2x4x128xf32>
    tpu.vector_store %arg20[%c0_145, %c0_146, %c128_147], %127 {strides = array<i32>} : memref<2x16x384xf32, #tpu.memory_space<vmem>>, vector<2x4x128xf32>,
    %129 = vector.extract_strided_slice %122 {offsets = [0, 0, 0], sizes = [2, 12, 128], strides = [1, 1, 1]} : vector<2x16x128xf32> to vector<2x12x128xf32>
    %c0_148 = arith.constant 0 : index
    %c4_149 = arith.constant 4 : index
    %c128_150 = arith.constant 128 : index
    %130 = vector.load %arg20[%c0_148, %c4_149, %c128_150] : memref<2x16x384xf32, #tpu.memory_space<vmem>>, vector<2x12x128xf32>
    tpu.vector_store %arg20[%c0_148, %c4_149, %c128_150], %129 {strides = array<i32>} : memref<2x16x384xf32, #tpu.memory_space<vmem>>, vector<2x12x128xf32>,
    %c0_151 = arith.constant 0 : index
    %c0_152 = arith.constant 0 : index
    %c256_153 = arith.constant 256 : index
    %131 = vector.load %arg20[%c0_151, %c0_152, %c256_153] : memref<2x16x384xf32, #tpu.memory_space<vmem>>, vector<2x16x128xf32>
    tpu.vector_store %arg20[%c0_151, %c0_152, %c256_153], %122 {strides = array<i32>} : memref<2x16x384xf32, #tpu.memory_space<vmem>>, vector<2x16x128xf32>,
    %c0_154 = arith.constant 0 : index
    %c0_155 = arith.constant 0 : index
    %c0_156 = arith.constant 0 : index
    %132 = vector.load %arg20[%c0_154, %c0_155, %c0_156] : memref<2x16x384xf32, #tpu.memory_space<vmem>>, vector<2x16x384xf32>
    %133 = vector.shape_cast %132 : vector<2x16x384xf32> to vector<32x384xf32>
    %c0_157 = arith.constant 0 : index
    %c0_158 = arith.constant 0 : index
    %134 = vector.load %arg15[%c0_157, %c0_158] : memref<384x128xf32, #tpu.memory_space<vmem>>, vector<384x128xf32>
    %cst_159 = arith.constant dense<0.000000e+00> : vector<32x128xf32>
    %135 = tpu.matmul %133, %134, %cst_159 {dimension_numbers = #tpu.dot_dimension_numbers<[1], [0], [0], [1], [0, 0, 1, 1], [], []>} : vector<32x384xf32>, vector<384x128xf32>, vector<32x128xf32> -> vector<32x128xf32>
    %136 = vector.shape_cast %135 : vector<32x128xf32> to vector<2x16x128xf32>
    %c0_160 = arith.constant 0 : index
    %c0_161 = arith.constant 0 : index
    %137 = vector.load %arg16[%c0_160, %c0_161] : memref<1x128xf32, #tpu.memory_space<vmem>>, vector<1x128xf32>
    %138 = vector.shape_cast %137 : vector<1x128xf32> to vector<1x1x128xf32>
    %139 = vector.broadcast %138 : vector<1x1x128xf32> to vector<2x16x128xf32>
    %140 = arith.addf %136, %139 : vector<2x16x128xf32>
    %cst_162 = arith.constant 0.000000e+00 : f32
    %141 = vector.broadcast %cst_162 : f32 to vector<2x16x128xf32>
    %142 = arith.maximumf %140, %141 : vector<2x16x128xf32>
    %143 = arith.addf %142, %102 : vector<2x16x128xf32>
    %cst_163 = arith.constant 0.000000e+00 : f32
    %144 = vector.broadcast %cst_163 : f32 to vector<2x16x128xf32>
    %145 = arith.maximumf %143, %144 : vector<2x16x128xf32>
    %cst_164 = arith.constant dense<0.000000e+00> : vector<2x128xf32>
    %146 = vector.multi_reduction <add>, %145, %cst_164 [1] : vector<2x16x128xf32> to vector<2x128xf32>
    %cst_165 = arith.constant 1.600000e+01 : f32
    %147 = vector.broadcast %cst_165 : f32 to vector<2x128xf32>
    %148 = arith.divf %146, %147 : vector<2x128xf32>
    %c0_166 = arith.constant 0 : index
    %c0_167 = arith.constant 0 : index
    %149 = vector.load %arg17[%c0_166, %c0_167] : memref<128x1xf32, #tpu.memory_space<vmem>>, vector<128x1xf32>
    %cst_168 = arith.constant dense<0.000000e+00> : vector<2x1xf32>
    %150 = tpu.matmul %148, %149, %cst_168 {dimension_numbers = #tpu.dot_dimension_numbers<[1], [0], [0], [1], [0, 0, 1, 1], [], []>} : vector<2x128xf32>, vector<128x1xf32>, vector<2x1xf32> -> vector<2x1xf32>
    %c0_169 = arith.constant 0 : index
    %c0_170 = arith.constant 0 : index
    %151 = vector.load %arg18[%c0_169, %c0_170] : memref<1x1xf32, #tpu.memory_space<vmem>>, vector<1x1xf32>
    %152 = vector.broadcast %151 : vector<1x1xf32> to vector<2x1xf32>
    %153 = arith.addf %150, %152 : vector<2x1xf32>
    %c0_171 = arith.constant 0 : index
    %c0_172 = arith.constant 0 : index
    %154 = vector.load %arg19[%c0_171, %c0_172] : memref<2x1xf32, #tpu.memory_space<vmem>>, vector<2x1xf32>
    tpu.vector_store %arg19[%c0_171, %c0_172], %153 {strides = array<i32>} : memref<2x1xf32, #tpu.memory_space<vmem>>, vector<2x1xf32>,
    return
  }
}

</mosaic_0001>

<bundles_post_ra>
// kernel: tpu_custom_call.1
= control target key start
LH: loop header
LB: loop body
LE: loop exit
PB: predicated region body
PF: predicated region fallthrough
CT: control target
= control target key end

     0   :  { %s3646_s0 = inlined_call_operand.hbm [shape: f32[2,16,128], index: 0, kind: input, shape index: {}]   ;;  %s3647_s1 = inlined_call_operand.hbm [shape: f32[384,128], index: 1, kind: input, shape index: {}]   ;;  %s3648_s2 = inlined_call_operand.vmem [shape: f32[1,128], index: 2, kind: input, shape index: {}]   ;;  %s3649_s3 = inlined_call_operand.hbm [shape: f32[384,128], index: 3, kind: input, shape index: {}]   ;;  %s3650_s4 = inlined_call_operand.vmem [shape: f32[1,128], index: 4, kind: input, shape index: {}]   ;;  %s3651_s5 = inlined_call_operand.vmem [shape: f32[128,128], index: 5, kind: input, shape index: {}]   ;;  %s3652_s6 = inlined_call_operand.vmem [shape: f32[1,128], index: 6, kind: input, shape index: {}]   ;;  %s3653_s7 = inlined_call_operand.hbm [shape: f32[384,128], index: 7, kind: input, shape index: {}]   ;;  %s3654_s8 = inlined_call_operand.vmem [shape: f32[1,128], index: 8, kind: input, shape index: {}]   ;;  %s3655_s9 = inlined_call_operand.hbm [shape: f32[384,128], index: 9, kind: input, shape index: {}]   ;;  %s3656_s10 = inlined_call_operand.vmem [shape: f32[1,128], index: 10, kind: input, shape index: {}]   ;;  %s3657_s11 = inlined_call_operand.hbm [shape: f32[128,128], index: 11, kind: input, shape index: {}]   ;;  %s3658_s12 = inlined_call_operand.vmem [shape: f32[1,128], index: 12, kind: input, shape index: {}]   ;;  %s3659_s13 = inlined_call_operand.hbm [shape: f32[384,128], index: 13, kind: input, shape index: {}]   ;;  %s3660_s14 = inlined_call_operand.vmem [shape: f32[1,128], index: 14, kind: input, shape index: {}]   ;;  %s3661_s15 = inlined_call_operand.hbm [shape: f32[384,128], index: 15, kind: input, shape index: {}]   ;;  %s3662_s16 = inlined_call_operand.vmem [shape: f32[1,128], index: 16, kind: input, shape index: {}]   ;;  %s3663_s17 = inlined_call_operand.vmem [shape: f32[128,1], index: 17, kind: input, shape index: {}]   ;;  %s3664_s18 = inlined_call_operand.<no memory space> [shape: f32[1,1], index: 18, kind: input, shape index: {}]   ;;  %s3665_s19 = inlined_call_operand.vmem [shape: f32[2,1], index: 19, kind: output, shape index: {}]  }
   0x1   :  { %3666 = sst [smem:[#allocation22_spill]] %s3646_s0  ;;  %v24_v0 = vstv %s3664_s18 }
   0x2   :  { %3667 = sst [smem:[#allocation23_spill]] %s3647_s1  ;;  %25 = vst [vmem:[#allocation3] sm:$0x1] %v24_v0 }
   0x3   :  { %3668 = sst [smem:[#allocation24_spill]] %s3648_s2 }
   0x4   :  { %3669 = sst [smem:[#allocation25_spill]] %s3649_s3 }
   0x5   :  { %26 = vsyncpa [#allocation5], 0 }
   0x6   :  { %27 = vsyncpa [#allocation7], 0 }
   0x7   :  { %28 = vsyncpa [#allocation10], 0 }
   0x8   :  { %29 = vsyncpa [#allocation13], 0 }
   0x9   :  { %30 = vsyncpa [#allocation16], 0  ;;  %s3211_s20 = smov [#allocation6]   ;;  %s3212_s1 = smov [#allocation9]  }
   0xa   :  { %s48_s21 = sshll.u32 %s3211_s20, 4  ;;  %s80_s22 = sshll.u32 %s3212_s1, 4  ;;  %s49_s21 = int_to_ptr.vmem [resolvable:$true] %s48_s21  ;;  %s81_s22 = int_to_ptr.vmem [resolvable:$true] %s80_s22 }
   0xb   :  { %s3049_s2 = scalar_lea.vmem %s49_s21, 6144  ;;  %p3054_p1 = scmp.lt.s32.totalorder %s49_s21, %s49_s21 }
   0xc   :  { %p3050_p0 = scmp.ne.s32.totalorder %s49_s21, %s3049_s2  ;;  %p3055_p2 = scmp.lt.s32.totalorder %s3049_s2, %s3049_s2 }
   0xe   :  { %p3056_p3 = por %p3055_p2, %p3054_p1 }
  0x10   :  { %p3057_p4 = pnand %p3056_p3, %p3050_p0 }
  0x12   :  { %3060 = shalt.err (!%p3057_p4)
}
  0x13   :  { %s3213_s18 = smov 128   ;;  %s3214_s23 = smov 8  }
  0x14   :  { %s3670_s3 = sld [smem:[#allocation23_spill]]  ;;  %s3069_s26 = scalar_lea.vmem %s81_s22, 6144 }
  0x15   :  { %p3070_p5 = scmp.ne.s32.totalorder %s81_s22, %s3069_s26  ;;  %p3074_p6 = scmp.lt.s32.totalorder %s81_s22, %s81_s22 }
  0x16   :  { %p3075_p7 = scmp.lt.s32.totalorder %s3069_s26, %s3069_s26 }
  0x18   :  { %p3076_p8 = por %p3075_p7, %p3074_p6 }
  0x1a   :  { %54 = dma.hbm_to_vmem [thread:$0]  %s3670_s3, 6144, %s49_s21, [#allocation7], %s3213_s18, %s3213_s18, %s3214_s23  }
  0x1b   :  { %p3077_p9 = pnand %p3076_p8, %p3070_p5 }
  0x1d   :  { %3080 = shalt.err (!%p3077_p9)
}
  0x1e   :  { %86 = dma.hbm_to_vmem [thread:$0]  %s3653_s7, 6144, %s81_s22, [#allocation10], %s3213_s18, %s3213_s18, %s3214_s23  }
  0x1f   :  { %s3215_s29 = smov [#allocation12]   ;;  %s3216_s30 = smov [#allocation4]  }
  0x20   :  { %s108_s0 = sshll.u32 %s3215_s29, 4  ;;  %s36_s20 = sshll.u32 %s3216_s30, 4  ;;  %s109_s0 = int_to_ptr.vmem [resolvable:$true] %s108_s0  ;;  %s37_s20 = int_to_ptr.vmem [resolvable:$true] %s36_s20 }
  0x21   :  { %s3089_s21 = scalar_lea.vmem %s109_s0, 2048  ;;  %p3094_p11 = scmp.lt.s32.totalorder %s109_s0, %s109_s0 }
  0x22   :  { %p3090_p10 = scmp.ne.s32.totalorder %s109_s0, %s3089_s21  ;;  %p3095_p12 = scmp.lt.s32.totalorder %s3089_s21, %s3089_s21 }
  0x24   :  { %p3096_p13 = por %p3095_p12, %p3094_p11 }
  0x26   :  { %p3097_p0 = pnand %p3096_p13, %p3090_p10 }
  0x28   :  { %3100 = shalt.err (!%p3097_p0)
}
  0x29   :  { %114 = dma.hbm_to_vmem [thread:$0]  %s3657_s11, 2048, %s109_s0, [#allocation13], %s3213_s18, %s3213_s18, %s3214_s23  }
  0x2a   :  { %s3109_s7 = scalar_lea.vmem %s37_s20, 512  ;;  %p3114_p2 = scmp.lt.s32.totalorder %s37_s20, %s37_s20 }
  0x2b   :  { %p3110_p1 = scmp.ne.s32.totalorder %s37_s20, %s3109_s7  ;;  %p3115_p3 = scmp.lt.s32.totalorder %s3109_s7, %s3109_s7 }
  0x2d   :  { %p3116_p4 = por %p3115_p3, %p3114_p2 }
  0x2f   :  { %p3117_p5 = pnand %p3116_p4, %p3110_p1 }
  0x31   :  { %3120 = shalt.err (!%p3117_p5)
}
  0x32   :  { %s3671_s25 = sld [smem:[#allocation22_spill]]  ;;  %s3217_s3 = smov [#allocation8]  }
  0x33   :  { %s62_s26 = sshll.u32 %s3217_s3, 4  ;;  %s3218_s27 = smov [#allocation11]   ;;  %s63_s26 = int_to_ptr.vmem [resolvable:$true] %s62_s26 }
  0x34   :  { %s94_s28 = sshll.u32 %s3218_s27, 4  ;;  %s3129_s11 = scalar_lea.vmem %s63_s26, 6144  ;;  %s95_s28 = int_to_ptr.vmem [resolvable:$true] %s94_s28 }
  0x35   :  { %p3130_p6 = scmp.ne.s32.totalorder %s63_s26, %s3129_s11  ;;  %p3134_p7 = scmp.lt.s32.totalorder %s63_s26, %s63_s26 }
  0x36   :  { %p3135_p8 = scmp.lt.s32.totalorder %s3129_s11, %s3129_s11 }
  0x38   :  { %42 = dma.hbm_to_vmem [thread:$0]  %s3671_s25, 512, %s37_s20, [#allocation5], %s3213_s18, %s3213_s18, %s3214_s23  }
  0x39   :  { %p3136_p9 = por %p3135_p8, %p3134_p7 }
  0x3b   :  { %p3137_p10 = pnand %p3136_p9, %p3130_p6 }
  0x3d   :  { %3140 = shalt.err (!%p3137_p10)
}
  0x3e   :  { %s3672_s30 = sld [smem:[#allocation25_spill]]  ;;  %s3149_s20 = scalar_lea.vmem %s95_s28, 6144 }
  0x3f   :  { %p3150_p11 = scmp.ne.s32.totalorder %s95_s28, %s3149_s20  ;;  %p3154_p12 = scmp.lt.s32.totalorder %s95_s28, %s95_s28 }
  0x40   :  { %p3155_p13 = scmp.lt.s32.totalorder %s3149_s20, %s3149_s20 }
  0x42   :  { %p3156_p0 = por %p3155_p13, %p3154_p12 }
  0x44   :  { %68 = dma.hbm_to_vmem [thread:$0]  %s3672_s30, 6144, %s63_s26, [#allocation7], %s3213_s18, %s3213_s18, %s3214_s23  }
  0x45   :  { %p3157_p1 = pnand %p3156_p0, %p3150_p11 }
  0x47   :  { %3160 = shalt.err (!%p3157_p1)
}
  0x48   :  { %100 = dma.hbm_to_vmem [thread:$0]  %s3655_s9, 6144, %s95_s28, [#allocation10], %s3213_s18, %s3213_s18, %s3214_s23  }
  0x49   :  { %s3219_s2 = smov [#allocation14]   ;;  %s3220_s22 = smov [#allocation15]  }
  0x4a   :  { %s122_s7 = sshll.u32 %s3219_s2, 4  ;;  %s136_s24 = sshll.u32 %s3220_s22, 4  ;;  %s123_s7 = int_to_ptr.vmem [resolvable:$true] %s122_s7  ;;  %s137_s24 = int_to_ptr.vmem [resolvable:$true] %s136_s24 }
  0x4b   :  { %s3169_s25 = scalar_lea.vmem %s123_s7, 6144  ;;  %p3174_p3 = scmp.lt.s32.totalorder %s123_s7, %s123_s7 }
  0x4c   :  { %p3170_p2 = scmp.ne.s32.totalorder %s123_s7, %s3169_s25  ;;  %p3175_p4 = scmp.lt.s32.totalorder %s3169_s25, %s3169_s25 }
  0x4e   :  { %p3176_p5 = por %p3175_p4, %p3174_p3 }
  0x50   :  { %p3177_p6 = pnand %p3176_p5, %p3170_p2 }
  0x52   :  { %3180 = shalt.err (!%p3177_p6)
}
  0x53   :  { %128 = dma.hbm_to_vmem [thread:$0]  %s3659_s13, 6144, %s123_s7, [#allocation13], %s3213_s18, %s3213_s18, %s3214_s23  }
  0x54   :  { %s3189_s9 = scalar_lea.vmem %s137_s24, 6144  ;;  %p3194_p8 = scmp.lt.s32.totalorder %s137_s24, %s137_s24 }
  0x55   :  { %p3190_p7 = scmp.ne.s32.totalorder %s137_s24, %s3189_s9  ;;  %p3195_p9 = scmp.lt.s32.totalorder %s3189_s9, %s3189_s9 }
  0x57   :  { %p3196_p10 = por %p3195_p9, %p3194_p8 }
  0x59   :  { %p3197_p11 = pnand %p3196_p10, %p3190_p7 }
  0x5b   :  { %3200 = shalt.err (!%p3197_p11)
}
  0x5c   :  { %142 = dma.hbm_to_vmem [thread:$0]  %s3661_s15, 6144, %s137_s24, [#allocation16], %s3213_s18, %s3213_s18, %s3214_s23  }
  0x5d   :  { %3201 = dma.done.wait [#allocation5], 512  }
  0x5e   :  { %3202 = vsyncadd [#allocation5], 4294966784 }
  0x5f   :  { %3203 = dma.done.wait [#allocation7], 12288  }
  0x60   :  { %3204 = vsyncadd [#allocation7], 4294955008 }
  0x61   :  { %3205 = dma.done.wait [#allocation10], 12288  }
  0x62   :  { %3206 = vsyncadd [#allocation10], 4294955008 }
  0x63   :  { %3207 = dma.done.wait [#allocation13], 8192  }
  0x64   :  { %3208 = vsyncadd [#allocation13], 4294959104 }
  0x65   :  { %3209 = dma.done.wait [#allocation16], 6144  }
  0x66   :  { %3210 = vsyncadd [#allocation16], 4294961152  ;;  %v3221_v1 = vmov 0.0   ;;  %v262_v2 = vld [vmem:[#allocation6 + $0xf8] sm:$0xff]  ;;  %v261_v5 = vld [vmem:[#allocation6 + $0xf0] sm:$0xff]  ;;  %vm200_vm0 = vcmask 1040384  }
  0x67   :  { %198 = vst [vmem:[#allocation2 + $0x40] sm:$0x1] %v3221_v1  ;;  %177 = vst [vmem:[#allocation2 + $0x20] sm:$0x3] %v3221_v1  ;;  %v278_v3 = vld [vmem:[#allocation6 + $0x178] sm:$0xff]  ;;  %2249 = vmatprep.subr.mxu0 %v262_v2  ;;  %v277_v6 = vld [vmem:[#allocation6 + $0x170] sm:$0xff] }
  0x68   :  { %178 = vst [vmem:[#allocation2] sm:$0x3] %v3221_v1  ;;  %199 = vst [vmem:[#allocation2 + $0x8] sm:$0x1] %v3221_v1  ;;  %v246_v4 = vld [vmem:[#allocation6 + $0x78] sm:$0xff]  ;;  %2690 = vmatprep.subr.mxu1 %v278_v3  ;;  %v245_v7 = vld [vmem:[#allocation6 + $0x70] sm:$0xff] }
  0x69   :  { %2250 = vmatpush3.msra.mxu0 %v246_v4  ;;  %2691 = vmatpush3.msra.mxu1 %v278_v3  ;;  %v260_v8 = vld [vmem:[#allocation6 + $0xe8] sm:$0xff]  ;;  %v259_v11 = vld [vmem:[#allocation6 + $0xe0] sm:$0xff]  ;;  %v258_v14 = vld [vmem:[#allocation6 + $0xd8] sm:$0xff]  ;;  %vm183_vm1 = vcmask 1041408   ;;  %s3673_s11 = sld [smem:[#allocation24_spill]]  ;;  %vm875_vm2 = vcmask 1043456  }
  0x6a   :  { %v276_v9 = vld [vmem:[#allocation6 + $0x168] sm:$0xff]  ;;  %2251 = vmatprep.subr.mxu0 %v261_v5  ;;  %2692 = vmatprep.subr.mxu1 %v277_v6  ;;  %v275_v12 = vld [vmem:[#allocation6 + $0x160] sm:$0xff]  ;;  %v274_v15 = vld [vmem:[#allocation6 + $0x158] sm:$0xff]  ;;  %vm3222_vm3 = vmmov 0   ;;  %vm2156_vm4 = vcmask 1041409   ;;  %vm2229_vm5 = vcmask 1024  }
  0x6b   :  { %v244_v10 = vld [vmem:[#allocation6 + $0x68] sm:$0xff]  ;;  %2252 = vmatpush3.msra.mxu0 %v245_v7  ;;  %2693 = vmatpush3.msra.mxu1 %v277_v6  ;;  %v243_v13 = vld [vmem:[#allocation6 + $0x60] sm:$0xff]  ;;  %v242_v16 = vld [vmem:[#allocation6 + $0x58] sm:$0xff] }
  0x6c   :  { %2253 = vmatprep.subr.mxu0 %v260_v8  ;;  %2694 = vmatprep.subr.mxu1 %v276_v9  ;;  %v257_v17 = vld [vmem:[#allocation6 + $0xd0] sm:$0xff]  ;;  %v256_v20 = vld [vmem:[#allocation6 + $0xc8] sm:$0xff]  ;;  %v255_v23 = vld [vmem:[#allocation6 + $0xc0] sm:$0xff] }
  0x6d   :  { %2254 = vmatpush3.msra.mxu0 %v244_v10  ;;  %2695 = vmatpush3.msra.mxu1 %v276_v9  ;;  %v273_v18 = vld [vmem:[#allocation6 + $0x150] sm:$0xff]  ;;  %v272_v21 = vld [vmem:[#allocation6 + $0x148] sm:$0xff]  ;;  %v271_v24 = vld [vmem:[#allocation6 + $0x140] sm:$0xff] }
  0x6e   :  { %2255 = vmatprep.subr.mxu0 %v259_v11  ;;  %2696 = vmatprep.subr.mxu1 %v275_v12  ;;  %v241_v19 = vld [vmem:[#allocation6 + $0x50] sm:$0xff]  ;;  %v240_v22 = vld [vmem:[#allocation6 + $0x48] sm:$0xff]  ;;  %v239_v25 = vld [vmem:[#allocation6 + $0x40] sm:$0xff] }
  0x6f   :  { %2256 = vmatpush3.msra.mxu0 %v243_v13  ;;  %2697 = vmatpush3.msra.mxu1 %v275_v12  ;;  %v254_v26 = vld [vmem:[#allocation6 + $0xb8] sm:$0xff]  ;;  %v253_v29 = vld [vmem:[#allocation6 + $0xb0] sm:$0xff]  ;;  %v3378_v31 = vld [vmem:[#allocation4] sm:$0xff] }
  0x70   :  { %2257 = vmatprep.subr.mxu0 %v258_v14  ;;  %2698 = vmatprep.subr.mxu1 %v274_v15  ;;  %v270_v27 = vld [vmem:[#allocation6 + $0x138] sm:$0xff]  ;;  %v269_v30 = vld [vmem:[#allocation6 + $0x130] sm:$0xff]  ;;  %v201_v34 = vrot.slane %v3378_v31, 7  ;;  %v184_v35 = vrot.slane %v3378_v31, 6  ;;  %v252_v36 = vld [vmem:[#allocation6 + $0xa8] sm:$0xff] }
  0x71   :  { %2258 = vmatpush3.msra.mxu0 %v242_v16  ;;  %2699 = vmatpush3.msra.mxu1 %v274_v15  ;;  %v238_v28 = vld [vmem:[#allocation6 + $0x38] sm:$0xff]  ;;  %v3380_v32 = vld [vmem:[#allocation4 + $0x10] sm:$0xff]  ;;  %v268_v37 = vld [vmem:[#allocation6 + $0x128] sm:$0xff] }
  0x72   :  { %2259 = vmatprep.subr.mxu0 %v257_v17  ;;  %2700 = vmatprep.subr.mxu1 %v273_v18  ;;  %v237_v33 = vld [vmem:[#allocation6 + $0x30] sm:$0xff]  ;;  %v204_v38 = vrot.slane %v3380_v32, 7  ;;  %v187_v39 = vrot.slane %v3380_v32, 6  ;;  %v236_v40 = vld [vmem:[#allocation6 + $0x28] sm:$0xff]  ;;  %211 = vst [vmem:[#allocation2 + $0x40] sm:$0xfe] %v201_v34 }
  0x73   :  { %2260 = vmatpush3.msra.mxu0 %v241_v19  ;;  %2701 = vmatpush3.msra.mxu1 %v273_v18  ;;  %194 = vst [vmem:[#allocation2 + $0x20] sm:$0xfc] %v184_v35  ;;  %v251_v41 = vld [vmem:[#allocation6 + $0xa0] sm:$0xff]  ;;  %v250_v44 = vld [vmem:[#allocation6 + $0x98] sm:$0xff]  ;;  %v249_v47 = vld [vmem:[#allocation6 + $0x90] sm:$0xff] }
  0x74   :  { %2261 = vmatprep.subr.mxu0 %v256_v20  ;;  %2702 = vmatprep.subr.mxu1 %v272_v21  ;;  %v267_v42 = vld [vmem:[#allocation6 + $0x120] sm:$0xff]  ;;  %213 = vst [vmem:[#allocation2 + $0x8] sm:$0xfe] %v204_v38  ;;  %196 = vst [vmem:[#allocation2] sm:$0xfc] %v187_v39  ;;  %v266_v45 = vld [vmem:[#allocation6 + $0x118] sm:$0xff] }
  0x75   :  { %2262 = vmatpush3.msra.mxu0 %v240_v22  ;;  %2703 = vmatpush3.msra.mxu1 %v272_v21  ;;  %v235_v43 = vld [vmem:[#allocation6 + $0x20] sm:$0xff]  ;;  %v234_v46 = vld [vmem:[#allocation6 + $0x18] sm:$0xff]  ;;  %v265_v48 = vld [vmem:[#allocation6 + $0x110] sm:$0xff] }
  0x76   :  { %2263 = vmatprep.subr.mxu0 %v255_v23  ;;  %2704 = vmatprep.subr.mxu1 %v271_v24  ;;  %v233_v49 = vld [vmem:[#allocation6 + $0x10] sm:$0xff]  ;;  %v248_v50 = vld [vmem:[#allocation6 + $0x88] sm:$0xff]  ;;  %v247_v58 = vld [vmem:[#allocation6 + $0x80] sm:$0xff] }
  0x77   :  { %2264 = vmatpush3.msra.mxu0 %v239_v25  ;;  %2705 = vmatpush3.msra.mxu1 %v271_v24  ;;  %v3394_v51 = vld [vmem:[#allocation4 + $0x8] sm:$0xff]  ;;  %v263_v59 = vld [vmem:[#allocation6 + $0x100] sm:$0xff]  ;;  %v547_v0 = vld [vmem:[#allocation8 + $0xf8] sm:$0xff] }
  0x78   :  { %2265 = vmatprep.subr.mxu0 %v254_v26  ;;  %2706 = vmatprep.subr.mxu1 %v270_v27  ;;  %v264_v52 = vld [vmem:[#allocation6 + $0x108] sm:$0xff]  ;;  %v202_v60 = vrot.slane %v3394_v51, 7  ;;  %v231_v61 = vld [vmem:[#allocation6] sm:$0xff]  ;;  %v185_v62 = vrot.slane %v3394_v51, 6  ;;  %v563_v2 = vld [vmem:[#allocation8 + $0x178] sm:$0xff] }
  0x79   :  { %2266 = vmatpush3.msra.mxu0 %v238_v28  ;;  %2707 = vmatpush3.msra.mxu1 %v270_v27  ;;  %v220_v53 = vld [vmem:[#allocation2 + $0x40] sm:$0xff]  ;;  %v232_v55 = vld [vmem:[#allocation6 + $0x8] sm:$0xff]  ;;  %v546_v7 = vld [vmem:[#allocation8 + $0xf0] sm:$0xff] }
  0x7a   :  { %2267 = vmatprep.subr.mxu0 %v253_v29  ;;  %2708 = vmatprep.subr.mxu1 %v269_v30  ;;  %v219_v54 = vld [vmem:[#allocation2 + $0x20] sm:$0xff]  ;;  %484 = vst [vmem:[#allocation2 + $0x40] sm:$0x1] %v3221_v1  ;;  %v203_v63 = vsel %vm200_vm0, %v201_v34, %v202_v60  ;;  %v186_v4 = vsel %vm183_vm1, %v184_v35, %v185_v62  ;;  %v530_v8 = vld [vmem:[#allocation8 + $0x70] sm:$0xff]  ;;  %v545_v10 = vld [vmem:[#allocation8 + $0xe8] sm:$0xff] }
  0x7b   :  { %2268 = vmatpush3.msra.mxu0 %v237_v33  ;;  %2709 = vmatpush3.msra.mxu1 %v269_v30  ;;  %464 = vst [vmem:[#allocation2 + $0x20] sm:$0x3] %v3221_v1  ;;  %v226_v56 = vld [vmem:[#allocation2 + $0x8] sm:$0xff]  ;;  %v225_v57 = vld [vmem:[#allocation2] sm:$0xff]  ;;  %v562_v9 = vld [vmem:[#allocation8 + $0x170] sm:$0xff] }
  0x7c   :  { %2269 = vmatprep.subr.mxu0 %v252_v36  ;;  %2710 = vmatprep.subr.mxu1 %v268_v37  ;;  %485 = vst [vmem:[#allocation2 + $0x8] sm:$0x1] %v3221_v1  ;;  %465 = vst [vmem:[#allocation2] sm:$0x3] %v3221_v1  ;;  %v531_v3 = vld [vmem:[#allocation8 + $0x78] sm:$0xff]  ;;  %v561_v12 = vld [vmem:[#allocation8 + $0x168] sm:$0xff] }
  0x7d   :  { %2270 = vmatpush3.msra.mxu0 %v236_v40  ;;  %2711 = vmatpush3.msra.mxu1 %v268_v37  ;;  %v3411_v5 = vld [vmem:[#allocation4 + $0x18] sm:$0xff]  ;;  %v529_v14 = vld [vmem:[#allocation8 + $0x68] sm:$0xff]  ;;  %v544_v15 = vld [vmem:[#allocation8 + $0xe0] sm:$0xff] }
  0x7e   :  { %2271 = vmatprep.subr.mxu0 %v251_v41  ;;  %2712 = vmatprep.subr.mxu1 %v267_v42  ;;  %v205_v6 = vrot.slane %v3411_v5, 7  ;;  %v188_v11 = vrot.slane %v3411_v5, 6  ;;  %v528_v16 = vld [vmem:[#allocation8 + $0x60] sm:$0xff]  ;;  %v543_v19 = vld [vmem:[#allocation8 + $0xd8] sm:$0xff]  ;;  %v542_v21 = vld [vmem:[#allocation8 + $0xd0] sm:$0xff] }
  0x7f   :  { %2272 = vmatpush3.msra.mxu0 %v235_v43  ;;  %2713 = vmatpush3.msra.mxu1 %v267_v42  ;;  %v560_v17 = vld [vmem:[#allocation8 + $0x160] sm:$0xff]  ;;  %v527_v20 = vld [vmem:[#allocation8 + $0x58] sm:$0xff]  ;;  %v558_v23 = vld [vmem:[#allocation8 + $0x150] sm:$0xff] }
  0x80   :  { %2273 = vmatprep.subr.mxu0 %v250_v44  ;;  %2714 = vmatprep.subr.mxu1 %v266_v45  ;;  %v206_v13 = vsel %vm200_vm0, %v204_v38, %v205_v6  ;;  %v189_v18 = vsel %vm183_vm1, %v187_v39, %v188_v11  ;;  %v559_v22 = vld [vmem:[#allocation8 + $0x158] sm:$0xff]  ;;  %v557_v24 = vld [vmem:[#allocation8 + $0x148] sm:$0xff]  ;;  %v556_v25 = vld [vmem:[#allocation8 + $0x140] sm:$0xff] }
  0x81   :  { %2274 = vmatpush3.msra.mxu0 %v234_v46  ;;  %2715 = vmatpush3.msra.mxu1 %v266_v45  ;;  %v555_v26 = vld [vmem:[#allocation8 + $0x138] sm:$0xff]  ;;  %v526_v27 = vld [vmem:[#allocation8 + $0x50] sm:$0xff]  ;;  %v541_v28 = vld [vmem:[#allocation8 + $0xc8] sm:$0xff] }
  0x82   :  { %2275 = vmatprep.subr.mxu0 %v249_v47  ;;  %2716 = vmatprep.subr.mxu1 %v265_v48  ;;  %v554_v29 = vld [vmem:[#allocation8 + $0x130] sm:$0xff]  ;;  %v525_v30 = vld [vmem:[#allocation8 + $0x48] sm:$0xff]  ;;  %v540_v33 = vld [vmem:[#allocation8 + $0xc0] sm:$0xff] }
  0x83   :  { %2276 = vmatpush3.msra.mxu0 %v233_v49  ;;  %2717 = vmatpush3.msra.mxu1 %v265_v48  ;;  %v553_v34 = vld [vmem:[#allocation8 + $0x128] sm:$0xff]  ;;  %v524_v35 = vld [vmem:[#allocation8 + $0x40] sm:$0xff]  ;;  %v539_v36 = vld [vmem:[#allocation8 + $0xb8] sm:$0xff] }
  0x84   :  { %2277 = vmatprep.subr.mxu0 %v248_v50  ;;  %2718 = vmatprep.subr.mxu1 %v264_v52  ;;  %v552_v37 = vld [vmem:[#allocation8 + $0x120] sm:$0xff]  ;;  %v523_v38 = vld [vmem:[#allocation8 + $0x38] sm:$0xff]  ;;  %v538_v39 = vld [vmem:[#allocation8 + $0xb0] sm:$0xff] }
  0x85   :  { %2278 = vmatpush3.msra.mxu0 %v232_v55  ;;  %2719 = vmatpush3.msra.mxu1 %v264_v52  ;;  %v551_v40 = vld [vmem:[#allocation8 + $0x118] sm:$0xff]  ;;  %v522_v41 = vld [vmem:[#allocation8 + $0x30] sm:$0xff]  ;;  %v537_v42 = vld [vmem:[#allocation8 + $0xa8] sm:$0xff] }
  0x86   :  { %2279 = vmatprep.subr.mxu0 %v247_v58  ;;  %2720 = vmatprep.subr.mxu1 %v263_v59  ;;  %v550_v43 = vld [vmem:[#allocation8 + $0x110] sm:$0xff]  ;;  %v521_v44 = vld [vmem:[#allocation8 + $0x28] sm:$0xff]  ;;  %v536_v45 = vld [vmem:[#allocation8 + $0xa0] sm:$0xff] }
  0x87   :  { %2280 = vmatpush3.msra.mxu0 %v231_v61  ;;  %343 = vmatprep.mubr.f32.mxu0 %v220_v53  ;;  %v549_v46 = vld [vmem:[#allocation8 + $0x108] sm:$0xff]  ;;  %v520_v47 = vld [vmem:[#allocation8 + $0x20] sm:$0xff]  ;;  %v535_v48 = vld [vmem:[#allocation8 + $0x98] sm:$0xff] }
  0x88   :  { %2721 = vmatpush3.msra.mxu1 %v263_v59  ;;  %2722 = vmatprep.mubr.f32.mxu1 %v3378_v31  ;;  %v548_v49 = vld [vmem:[#allocation8 + $0x100] sm:$0xff]  ;;  %v519_v50 = vld [vmem:[#allocation8 + $0x18] sm:$0xff]  ;;  %v534_v52 = vld [vmem:[#allocation8 + $0x90] sm:$0xff] }
  0x89   :  { %344 = vmatmul.mubr.f32.vlgmr.msra.gmra.mxu0 %v219_v54  ;;  %2723 = vmatmul.mubr.f32.vlgmr.msra.gmra.mxu1 %v3394_v51  ;;  %v518_v53 = vld [vmem:[#allocation8 + $0x10] sm:$0xff]  ;;  %v533_v54 = vld [vmem:[#allocation8 + $0x88] sm:$0xff] }
  0x8a   :  { %348 = vmatprep.mubr.f32.mxu0 %v203_v63  ;;  %2725 = vmatprep.mubr.f32.mxu1 %v3380_v32  ;;  %v517_v55 = vld [vmem:[#allocation8 + $0x8] sm:$0xff]  ;;  %v764_v58 = vld [vmem:[%s3651_s5 + $0x78] sm:$0xff] }
  0x8b   :  { %2313 = vmatprep.subr.mxu0 %v547_v0  ;;  %2728 = vmatprep.subr.mxu1 %v563_v2  ;;  %v2240_v0 = vld [vmem:[%s3673_s11] ss:$0 sm:$0xff] }
  0x8c   :  { %2314 = vmatpush3.msra.mxu0 %v531_v3  ;;  %2729 = vmatpush3.msra.mxu1 %v563_v2 }
  0x8d   :  { %349 = vmatmul.mubr.f32.gmra.mxu0 %v186_v4  ;;  %2726 = vmatmul.mubr.f32.gmra.mxu1 %v3411_v5 }
  0x8e   :  { %353 = vmatprep.mubr.f32.mxu0 %v226_v56  ;;  %2315 = vmatprep.subr.mxu0 %v546_v7  ;;  %v532_v56 = vld [vmem:[#allocation8 + $0x80] sm:$0xff] }
  0x8f   :  { %2316 = vmatpush3.msra.mxu0 %v530_v8  ;;  %2730 = vmatprep.subr.mxu1 %v562_v9 }
  0x90   :  { %2317 = vmatprep.subr.mxu0 %v545_v10  ;;  %2731 = vmatpush3.msra.mxu1 %v562_v9 }
  0x91   :  { %354 = vmatmul.mubr.f32.gmra.mxu0 %v225_v57  ;;  %2732 = vmatprep.subr.mxu1 %v561_v12  ;;  %v516_v57 = vld [vmem:[#allocation8] sm:$0xff] }
  0x92   :  { %358 = vmatprep.mubr.f32.mxu0 %v206_v13  ;;  %2318 = vmatpush3.msra.mxu0 %v529_v14 }
  0x93   :  { %2319 = vmatprep.subr.mxu0 %v544_v15  ;;  %2733 = vmatpush3.msra.mxu1 %v561_v12 }
  0x94   :  { %2320 = vmatpush3.msra.mxu0 %v528_v16  ;;  %2734 = vmatprep.subr.mxu1 %v560_v17 }
  0x95   :  { %359 = vmatmul.mubr.f32.gmra.mxu0 %v189_v18  ;;  %2321 = vmatprep.subr.mxu0 %v543_v19 }
  0x96   :  { %2322 = vmatpush3.msra.mxu0 %v527_v20  ;;  %2735 = vmatpush3.msra.mxu1 %v560_v17 }
  0x97   :  { %2323 = vmatprep.subr.mxu0 %v542_v21  ;;  %2736 = vmatprep.subr.mxu1 %v559_v22 }
  0x98   :  { %2737 = vmatpush3.msra.mxu1 %v559_v22  ;;  %2324 = vmatpush3.msra.mxu0 %v526_v27 }
  0x99   :  { %2738 = vmatprep.subr.mxu1 %v558_v23  ;;  %2325 = vmatprep.subr.mxu0 %v541_v28 }
  0x9a   :  { %2739 = vmatpush3.msra.mxu1 %v558_v23  ;;  %2326 = vmatpush3.msra.mxu0 %v525_v30 }
  0x9b   :  { %2740 = vmatprep.subr.mxu1 %v557_v24  ;;  %2327 = vmatprep.subr.mxu0 %v540_v33 }
  0x9c   :  { %2741 = vmatpush3.msra.mxu1 %v557_v24  ;;  %2328 = vmatpush3.msra.mxu0 %v524_v35 }
  0x9d   :  { %2742 = vmatprep.subr.mxu1 %v556_v25  ;;  %2329 = vmatprep.subr.mxu0 %v539_v36  ;;  %v763_v36 = vld [vmem:[%s3651_s5 + $0x70] sm:$0xff] }
  0x9e   :  { %2743 = vmatpush3.msra.mxu1 %v556_v25  ;;  %2330 = vmatpush3.msra.mxu0 %v523_v38  ;;  %v762_v38 = vld [vmem:[%s3651_s5 + $0x68] sm:$0xff] }
  0x9f   :  { %2744 = vmatprep.subr.mxu1 %v555_v26  ;;  %2331 = vmatprep.subr.mxu0 %v538_v39 }
  0xa0   :  { %2745 = vmatpush3.msra.mxu1 %v555_v26  ;;  %2332 = vmatpush3.msra.mxu0 %v522_v41  ;;  %v761_v41 = vld [vmem:[%s3651_s5 + $0x60] sm:$0xff] }
  0xa1   :  { %2746 = vmatprep.subr.mxu1 %v554_v29  ;;  %2333 = vmatprep.subr.mxu0 %v537_v42 }
  0xa2   :  { %2747 = vmatpush3.msra.mxu1 %v554_v29  ;;  %2334 = vmatpush3.msra.mxu0 %v521_v44 }
  0xa3   :  { %2748 = vmatprep.subr.mxu1 %v553_v34  ;;  %2335 = vmatprep.subr.mxu0 %v536_v45 }
  0xa4   :  { %2749 = vmatpush3.msra.mxu1 %v553_v34  ;;  %2336 = vmatpush3.msra.mxu0 %v520_v47  ;;  %v759_v47 = vld [vmem:[%s3651_s5 + $0x50] sm:$0xff] }
  0xa5   :  { %2750 = vmatprep.subr.mxu1 %v552_v37  ;;  %2337 = vmatprep.subr.mxu0 %v535_v48 }
  0xa6   :  { %2751 = vmatpush3.msra.mxu1 %v552_v37  ;;  %2338 = vmatpush3.msra.mxu0 %v519_v50  ;;  %v757_v50 = vld [vmem:[%s3651_s5 + $0x40] sm:$0xff] }
  0xa7   :  { %2752 = vmatprep.subr.mxu1 %v551_v40  ;;  %2339 = vmatprep.subr.mxu0 %v534_v52  ;;  %v756_v52 = vld [vmem:[%s3651_s5 + $0x38] sm:$0xff] }
  0xa8   :  { %2753 = vmatpush3.msra.mxu1 %v551_v40  ;;  %2340 = vmatpush3.msra.mxu0 %v518_v53  ;;  %v755_v53 = vld [vmem:[%s3651_s5 + $0x30] sm:$0xff] }
  0xa9   :  { %2754 = vmatprep.subr.mxu1 %v550_v43  ;;  %2341 = vmatprep.subr.mxu0 %v533_v54  ;;  %v754_v54 = vld [vmem:[%s3651_s5 + $0x28] sm:$0xff] }
  0xaa   :  { %2755 = vmatpush3.msra.mxu1 %v550_v43  ;;  %2342 = vmatpush3.msra.mxu0 %v517_v55  ;;  %v760_v43 = vld [vmem:[%s3651_s5 + $0x58] sm:$0xff]  ;;  %v753_v55 = vld [vmem:[%s3651_s5 + $0x20] sm:$0xff] }
  0xab   :  { %2756 = vmatprep.subr.mxu1 %v549_v46  ;;  %2343 = vmatprep.subr.mxu0 %v532_v56  ;;  %v751_v56 = vld [vmem:[%s3651_s5 + $0x10] sm:$0xff] }
  0xac   :  { %2757 = vmatpush3.msra.mxu1 %v549_v46  ;;  %2344 = vmatpush3.msra.mxu0 %v516_v57  ;;  %v750_v57 = vld [vmem:[%s3651_s5 + $0x8] sm:$0xff] }
  0xad   :  { %2758 = vmatprep.subr.mxu1 %v548_v49  ;;  %2766 = vmatprep.subr.mxu0 %v764_v58 }
  0xae   :  { %2759 = vmatpush3.msra.mxu1 %v548_v49  ;;  %v758_v49 = vld [vmem:[%s3651_s5 + $0x48] sm:$0xff] }
 0x149   :  { %v2281_v59 = vpop.f32.mrf.mxu0  ;;  %v2724_v60 = vpop.f32.mrf.mxu1 }
 0x14b   :  { %v2282_v61 = vpop.f32.mrf.mxu0  ;;  %v430_v63 = vpop.f32.mrf.mxu1 }
 0x14c   :  { %v2283_v62 = vadd.f32 %v2282_v61, %v2281_v59  ;;  %v969_v59 = vld [vmem:[#allocation9 + $0x178] sm:$0xff]  ;;  %v967_v61 = vld [vmem:[#allocation9 + $0x168] sm:$0xff] }
 0x14d   :  { %v2284_v2 = vpop.f32.mrf.mxu0  ;;  %v2727_v6 = vpop.f32.mrf.mxu1 }
 0x14e   :  { %v431_v3 = vadd.f32 %v2283_v62, %v430_v63  ;;  %v966_v62 = vld [vmem:[#allocation9 + $0x160] sm:$0xff]  ;;  %v965_v63 = vld [vmem:[#allocation9 + $0x158] sm:$0xff] }
 0x14f   :  { %v2285_v4 = vpop.f32.mrf.mxu0  ;;  %v440_v13 = vpop.f32.mrf.mxu1 }
 0x150   :  { %v456_v7 = vadd.f32 %v2240_v0, %v431_v3  ;;  %v2286_v8 = vadd.f32 %v2285_v4, %v2284_v2  ;;  %v936_v2 = vld [vmem:[#allocation9 + $0x70] sm:$0xff]  ;;  %v951_v3 = vld [vmem:[#allocation9 + $0xe8] sm:$0xff] }
 0x151   :  { %v2287_v9 = vpop.f32.mrf.mxu0  ;;  %v935_v4 = vld [vmem:[#allocation9 + $0x68] sm:$0xff] }
 0x152   :  { %v460_v10 = vmax.f32 %v456_v7, 0.0  ;;  %v436_v11 = vadd.f32 %v2724_v60, %v2286_v8  ;;  %v968_v60 = vld [vmem:[#allocation9 + $0x170] sm:$0xff]  ;;  %v934_v7 = vld [vmem:[#allocation9 + $0x60] sm:$0xff]  ;;  %v963_v8 = vld [vmem:[#allocation9 + $0x148] sm:$0xff] }
 0x153   :  { %v2288_v12 = vpop.f32.mrf.mxu0 }
 0x154   :  { %v470_v14 = vrot.slane %v460_v10, 6  ;;  %v486_v15 = vrot.slane %v460_v10, 7  ;;  %v457_v16 = vadd.f32 %v2240_v0, %v436_v11  ;;  %v2289_v17 = vadd.f32 %v2288_v12, %v2287_v9  ;;  %2760 = vmatprep.mubr.f32.mxu1 %v460_v10  ;;  %v962_v9 = vld [vmem:[#allocation9 + $0x140] sm:$0xff]  ;;  %v949_v10 = vld [vmem:[#allocation9 + $0xd8] sm:$0xff] }
 0x155   :  { %v2290_v18 = vpop.f32.mrf.mxu0  ;;  %v933_v11 = vld [vmem:[#allocation9 + $0x58] sm:$0xff] }
 0x156   :  { %480 = vst [vmem:[#allocation2 + $0x20] sm:$0xfc] %v470_v14  ;;  %496 = vst [vmem:[#allocation2 + $0x40] sm:$0xfe] %v486_v15  ;;  %v461_v19 = vmax.f32 %v457_v16, 0.0  ;;  %v441_v20 = vadd.f32 %v2289_v17, %v440_v13  ;;  %v961_v12 = vld [vmem:[#allocation9 + $0x138] sm:$0xff] }
 0x157   :  { %v2291_v21 = vpop.f32.mrf.mxu0  ;;  %v948_v13 = vld [vmem:[#allocation9 + $0xd0] sm:$0xff]  ;;  %v959_v16 = vld [vmem:[#allocation9 + $0x128] sm:$0xff] }
 0x158   :  { %v458_v22 = vadd.f32 %v2240_v0, %v441_v20  ;;  %v2292_v23 = vadd.f32 %v2291_v21, %v2290_v18  ;;  %2761 = vmatmul.mubr.f32.vlgmr.msra.gmra.mxu1 %v461_v19  ;;  %v487_v26 = vrot.slane %v461_v19, 7  ;;  %v471_v34 = vrot.slane %v461_v19, 6  ;;  %v947_v17 = vld [vmem:[#allocation9 + $0xc8] sm:$0xff]  ;;  %v958_v19 = vld [vmem:[#allocation9 + $0x120] sm:$0xff] }
 0x159   :  { %v931_v18 = vld [vmem:[#allocation9 + $0x48] sm:$0xff]  ;;  %v946_v20 = vld [vmem:[#allocation9 + $0xc0] sm:$0xff] }
 0x15a   :  { %v462_v24 = vmax.f32 %v458_v22, 0.0  ;;  %v446_v25 = vadd.f32 %v2727_v6, %v2292_v23  ;;  %v488_v37 = vsel %vm200_vm0, %v486_v15, %v487_v26  ;;  %v472_v40 = vsel %vm183_vm1, %v470_v14, %v471_v34  ;;  %v950_v6 = vld [vmem:[#allocation9 + $0xe0] sm:$0xff]  ;;  %v932_v14 = vld [vmem:[#allocation9 + $0x50] sm:$0xff]  ;;  %v957_v22 = vld [vmem:[#allocation9 + $0x118] sm:$0xff] }
 0x15b   :  { %v960_v15 = vld [vmem:[#allocation9 + $0x130] sm:$0xff]  ;;  %v930_v21 = vld [vmem:[#allocation9 + $0x40] sm:$0xff]  ;;  %v945_v23 = vld [vmem:[#allocation9 + $0xb8] sm:$0xff] }
 0x15c   :  { %v473_v27 = vrot.slane %v462_v24, 6  ;;  %v489_v28 = vrot.slane %v462_v24, 7  ;;  %v459_v29 = vadd.f32 %v2240_v0, %v446_v25  ;;  %2763 = vmatprep.mubr.f32.mxu1 %v462_v24  ;;  %v953_v0 = vld [vmem:[#allocation9 + $0xf8] sm:$0xff]  ;;  %v956_v25 = vld [vmem:[#allocation9 + $0x110] sm:$0xff]  ;;  %v942_v34 = vld [vmem:[#allocation9 + $0xa0] sm:$0xff] }
 0x15d   :  { %v505_v30 = vld [vmem:[#allocation2 + $0x40] sm:$0xff]  ;;  %2397 = vmatprep.subr.mxu1 %v953_v0  ;;  %v944_v26 = vld [vmem:[#allocation9 + $0xb0] sm:$0xff] }
 0x15e   :  { %v504_v33 = vld [vmem:[#allocation2 + $0x20] sm:$0xff]  ;;  %482 = vst [vmem:[#allocation2] sm:$0xfc] %v473_v27  ;;  %498 = vst [vmem:[#allocation2 + $0x8] sm:$0xfe] %v489_v28  ;;  %v463_v35 = vmax.f32 %v459_v29, 0.0  ;;  %628 = vmatprep.mubr.f32.mxu0 %v505_v30 }
 0x15f   :  { %890 = vst [vmem:[#allocation2 + $0x40] sm:$0x3] %v3221_v1  ;;  %869 = vst [vmem:[#allocation2 + $0x20] sm:$0xf] %v3221_v1  ;;  %629 = vmatmul.mubr.f32.vlgmr.msra.gmra.mxu0 %v504_v33  ;;  %v929_v24 = vld [vmem:[#allocation9 + $0x38] sm:$0xff]  ;;  %v943_v29 = vld [vmem:[#allocation9 + $0xa8] sm:$0xff] }
 0x160   :  { %2767 = vmatpush3.msra.mxu0 %v764_v58  ;;  %633 = vmatprep.mubr.f32.mxu0 %v488_v37  ;;  %v490_v39 = vrot.slane %v463_v35, 7  ;;  %v474_v42 = vrot.slane %v463_v35, 6  ;;  %v749_v58 = vld [vmem:[%s3651_s5] sm:$0xff]  ;;  %v927_v33 = vld [vmem:[#allocation9 + $0x28] sm:$0xff] }
 0x161   :  { %2768 = vmatprep.subr.mxu0 %v763_v36  ;;  %2764 = vmatmul.mubr.f32.gmra.mxu1 %v463_v35  ;;  %v954_v30 = vld [vmem:[#allocation9 + $0x100] sm:$0xff]  ;;  %v925_v37 = vld [vmem:[#allocation9 + $0x18] sm:$0xff] }
 0x162   :  { %2769 = vmatpush3.msra.mxu0 %v763_v36  ;;  %v491_v44 = vsel %vm200_vm0, %v489_v28, %v490_v39  ;;  %v475_v48 = vsel %vm183_vm1, %v473_v27, %v474_v42  ;;  %v955_v27 = vld [vmem:[#allocation9 + $0x108] sm:$0xff]  ;;  %v928_v28 = vld [vmem:[#allocation9 + $0x30] sm:$0xff]  ;;  %v926_v35 = vld [vmem:[#allocation9 + $0x20] sm:$0xff] }
 0x163   :  { %2770 = vmatprep.subr.mxu0 %v762_v38  ;;  %634 = vmatmul.mubr.f32.gmra.mxu0 %v472_v40  ;;  %v941_v36 = vld [vmem:[#allocation9 + $0x98] sm:$0xff]  ;;  %v924_v39 = vld [vmem:[#allocation9 + $0x10] sm:$0xff]  ;;  %v939_v40 = vld [vmem:[#allocation9 + $0x88] sm:$0xff] }
 0x164   :  { %2771 = vmatpush3.msra.mxu0 %v762_v38  ;;  %v940_v38 = vld [vmem:[#allocation9 + $0x90] sm:$0xff]  ;;  %v938_v42 = vld [vmem:[#allocation9 + $0x80] sm:$0xff] }
 0x165   :  { %2772 = vmatprep.subr.mxu0 %v761_v41  ;;  %v511_v45 = vld [vmem:[#allocation2 + $0x8] sm:$0xff]  ;;  %v510_v46 = vld [vmem:[#allocation2] sm:$0xff] }
 0x166   :  { %2773 = vmatpush3.msra.mxu0 %v761_v41  ;;  %638 = vmatprep.mubr.f32.mxu0 %v511_v45  ;;  %891 = vst [vmem:[#allocation2 + $0x8] sm:$0x3] %v3221_v1  ;;  %870 = vst [vmem:[#allocation2] sm:$0xf] %v3221_v1  ;;  %v923_v41 = vld [vmem:[#allocation9 + $0x8] sm:$0xff]  ;;  %v1254_v45 = vld [vmem:[#allocation11 + $0x178] sm:$0xff] }
 0x167   :  { %2774 = vmatprep.subr.mxu0 %v760_v43  ;;  %639 = vmatmul.mubr.f32.gmra.mxu0 %v510_v46 }
 0x168   :  { %2775 = vmatpush3.msra.mxu0 %v760_v43  ;;  %643 = vmatprep.mubr.f32.mxu0 %v491_v44  ;;  %v922_v43 = vld [vmem:[#allocation9] sm:$0xff]  ;;  %v1238_v44 = vld [vmem:[#allocation11 + $0xf8] sm:$0xff] }
 0x169   :  { %2776 = vmatprep.subr.mxu0 %v759_v47 }
 0x16a   :  { %2777 = vmatpush3.msra.mxu0 %v759_v47 }
 0x16b   :  { %2778 = vmatprep.subr.mxu0 %v758_v49  ;;  %644 = vmatmul.mubr.f32.gmra.mxu0 %v475_v48 }
 0x16c   :  { %2779 = vmatpush3.msra.mxu0 %v758_v49  ;;  %2798 = vmatprep.mubr.f32.mxu0 %v3378_v31  ;;  %v752_v31 = vld [vmem:[%s3651_s5 + $0x18] sm:$0xff] }
 0x16d   :  { %2780 = vmatprep.subr.mxu0 %v757_v50 }
 0x16e   :  { %2781 = vmatpush3.msra.mxu0 %v757_v50 }
 0x16f   :  { %2782 = vmatprep.subr.mxu0 %v756_v52 }
 0x170   :  { %2783 = vmatpush3.msra.mxu0 %v756_v52 }
 0x171   :  { %2784 = vmatprep.subr.mxu0 %v755_v53 }
 0x172   :  { %2785 = vmatpush3.msra.mxu0 %v755_v53 }
 0x173   :  { %2786 = vmatprep.subr.mxu0 %v754_v54 }
 0x174   :  { %2787 = vmatpush3.msra.mxu0 %v754_v54 }
 0x175   :  { %2788 = vmatprep.subr.mxu0 %v753_v55 }
 0x176   :  { %2789 = vmatpush3.msra.mxu0 %v753_v55 }
 0x177   :  { %2790 = vmatprep.subr.mxu0 %v752_v31 }
 0x178   :  { %2791 = vmatpush3.msra.mxu0 %v752_v31 }
 0x179   :  { %2792 = vmatprep.subr.mxu0 %v751_v56 }
 0x17a   :  { %2793 = vmatpush3.msra.mxu0 %v751_v56 }
 0x17b   :  { %2794 = vmatprep.subr.mxu0 %v750_v57 }
 0x17c   :  { %2795 = vmatpush3.msra.mxu0 %v750_v57 }
 0x17d   :  { %2796 = vmatprep.subr.mxu0 %v749_v58 }
 0x17e   :  { %2797 = vmatpush3.msra.mxu0 %v749_v58 }
 0x17f   :  { %2799 = vmatmul.mubr.f32.vlgmr.msra.gmra.mxu0 %v3394_v51  ;;  %2804 = vmatprep.subr.mxu0 %v969_v59  ;;  %v964_v51 = vld [vmem:[#allocation9 + $0x150] sm:$0xff] }
 0x180   :  { %2801 = vmatprep.mubr.f32.mxu0 %v3380_v32  ;;  %2805 = vmatpush3.msra.mxu0 %v969_v59  ;;  %v937_v32 = vld [vmem:[#allocation9 + $0x78] sm:$0xff] }
 0x181   :  { %2806 = vmatprep.subr.mxu0 %v968_v60  ;;  %2398 = vmatpush3.msra.mxu1 %v937_v32 }
 0x182   :  { %2807 = vmatpush3.msra.mxu0 %v968_v60 }
 0x183   :  { %2802 = vmatmul.mubr.f32.gmra.mxu0 %v3411_v5  ;;  %2808 = vmatprep.subr.mxu0 %v967_v61  ;;  %v952_v5 = vld [vmem:[#allocation9 + $0xf0] sm:$0xff] }
 0x184   :  { %2809 = vmatpush3.msra.mxu0 %v967_v61  ;;  %2399 = vmatprep.subr.mxu1 %v952_v5 }
 0x185   :  { %2810 = vmatprep.subr.mxu0 %v966_v62  ;;  %2400 = vmatpush3.msra.mxu1 %v936_v2 }
 0x186   :  { %2811 = vmatpush3.msra.mxu0 %v966_v62  ;;  %2401 = vmatprep.subr.mxu1 %v951_v3  ;;  %v2241_v62 = vld [vmem:[%s3650_s4] ss:$0 sm:$0xff] }
 0x187   :  { %2812 = vmatprep.subr.mxu0 %v965_v63  ;;  %2402 = vmatpush3.msra.mxu1 %v935_v4 }
 0x188   :  { %2813 = vmatpush3.msra.mxu0 %v965_v63  ;;  %2403 = vmatprep.subr.mxu1 %v950_v6 }
 0x189   :  { %2814 = vmatprep.subr.mxu0 %v964_v51  ;;  %2404 = vmatpush3.msra.mxu1 %v934_v7 }
 0x18a   :  { %2815 = vmatpush3.msra.mxu0 %v964_v51  ;;  %2405 = vmatprep.subr.mxu1 %v949_v10  ;;  %v2242_v51 = vld [vmem:[%s3652_s6] ss:$0 sm:$0xff] }
 0x18b   :  { %2816 = vmatprep.subr.mxu0 %v963_v8  ;;  %2406 = vmatpush3.msra.mxu1 %v933_v11 }
 0x18c   :  { %2817 = vmatpush3.msra.mxu0 %v963_v8  ;;  %2407 = vmatprep.subr.mxu1 %v948_v13 }
 0x18d   :  { %2818 = vmatprep.subr.mxu0 %v962_v9  ;;  %2408 = vmatpush3.msra.mxu1 %v932_v14 }
 0x18e   :  { %2819 = vmatpush3.msra.mxu0 %v962_v9  ;;  %2409 = vmatprep.subr.mxu1 %v947_v17 }
 0x18f   :  { %2820 = vmatprep.subr.mxu0 %v961_v12  ;;  %2410 = vmatpush3.msra.mxu1 %v931_v18 }
 0x190   :  { %2821 = vmatpush3.msra.mxu0 %v961_v12  ;;  %2411 = vmatprep.subr.mxu1 %v946_v20 }
 0x191   :  { %2822 = vmatprep.subr.mxu0 %v960_v15  ;;  %2412 = vmatpush3.msra.mxu1 %v930_v21 }
 0x192   :  { %2823 = vmatpush3.msra.mxu0 %v960_v15  ;;  %2413 = vmatprep.subr.mxu1 %v945_v23 }
 0x193   :  { %2824 = vmatprep.subr.mxu0 %v959_v16  ;;  %2414 = vmatpush3.msra.mxu1 %v929_v24 }
 0x194   :  { %2825 = vmatpush3.msra.mxu0 %v959_v16  ;;  %2415 = vmatprep.subr.mxu1 %v944_v26  ;;  %v1253_v26 = vld [vmem:[#allocation11 + $0x170] sm:$0xff] }
 0x195   :  { %2826 = vmatprep.subr.mxu0 %v958_v19  ;;  %2416 = vmatpush3.msra.mxu1 %v928_v28  ;;  %v1252_v28 = vld [vmem:[#allocation11 + $0x168] sm:$0xff] }
 0x196   :  { %2827 = vmatpush3.msra.mxu0 %v958_v19  ;;  %2417 = vmatprep.subr.mxu1 %v943_v29 }
 0x197   :  { %2828 = vmatprep.subr.mxu0 %v957_v22  ;;  %2418 = vmatpush3.msra.mxu1 %v927_v33 }
 0x198   :  { %2829 = vmatpush3.msra.mxu0 %v957_v22  ;;  %2419 = vmatprep.subr.mxu1 %v942_v34 }
 0x199   :  { %2830 = vmatprep.subr.mxu0 %v956_v25  ;;  %2420 = vmatpush3.msra.mxu1 %v926_v35  ;;  %v1251_v35 = vld [vmem:[#allocation11 + $0x160] sm:$0xff] }
 0x19a   :  { %2831 = vmatpush3.msra.mxu0 %v956_v25  ;;  %2421 = vmatprep.subr.mxu1 %v941_v36 }
 0x19b   :  { %2832 = vmatprep.subr.mxu0 %v955_v27  ;;  %2422 = vmatpush3.msra.mxu1 %v925_v37 }
 0x19c   :  { %2833 = vmatpush3.msra.mxu0 %v955_v27  ;;  %2423 = vmatprep.subr.mxu1 %v940_v38 }
 0x19d   :  { %2834 = vmatprep.subr.mxu0 %v954_v30  ;;  %2424 = vmatpush3.msra.mxu1 %v924_v39  ;;  %v1222_v39 = vld [vmem:[#allocation11 + $0x78] sm:$0xff] }
 0x19e   :  { %2835 = vmatpush3.msra.mxu0 %v954_v30  ;;  %2425 = vmatprep.subr.mxu1 %v939_v40  ;;  %v1237_v40 = vld [vmem:[#allocation11 + $0xf0] sm:$0xff] }
 0x19f   :  { %2426 = vmatpush3.msra.mxu1 %v923_v41  ;;  %2842 = vmatprep.subr.mxu0 %v1254_v45 }
 0x1a0   :  { %2427 = vmatprep.subr.mxu1 %v938_v42  ;;  %v1221_v42 = vld [vmem:[#allocation11 + $0x70] sm:$0xff] }
 0x1a1   :  { %2428 = vmatpush3.msra.mxu1 %v922_v43 }
 0x1a2   :  { %2461 = vmatprep.subr.mxu1 %v1238_v44  ;;  %v1236_v44 = vld [vmem:[#allocation11 + $0xe8] sm:$0xff] }
 0x218   :  { %v2762_v54 = vpop.f32.mrf.mxu1 }
 0x21a   :  { %v715_v57 = vpop.f32.mrf.mxu1 }
 0x21f   :  { %v2345_v46 = vpop.f32.mrf.mxu0 }
 0x221   :  { %v2346_v47 = vpop.f32.mrf.mxu0  ;;  %v2765_v61 = vpop.f32.mrf.mxu1 }
 0x222   :  { %v2347_v31 = vadd.f32 %v2346_v47, %v2345_v46 }
 0x223   :  { %v2348_v48 = vpop.f32.mrf.mxu0  ;;  %v725_v2 = vpop.f32.mrf.mxu1 }
 0x224   :  { %v716_v59 = vadd.f32 %v2347_v31, %v715_v57  ;;  %v1233_v57 = vld [vmem:[#allocation11 + $0xd0] sm:$0xff] }
 0x225   :  { %v2349_v49 = vpop.f32.mrf.mxu0 }
 0x226   :  { %v2350_v55 = vadd.f32 %v2349_v49, %v2348_v48  ;;  %v741_v32 = vadd.f32 %v2241_v62, %v716_v59  ;;  %v1235_v49 = vld [vmem:[#allocation11 + $0xe0] sm:$0xff]  ;;  %v1249_v59 = vld [vmem:[#allocation11 + $0x150] sm:$0xff] }
 0x227   :  { %v2351_v50 = vpop.f32.mrf.mxu0 }
 0x228   :  { %v721_v58 = vadd.f32 %v2762_v54, %v2350_v55  ;;  %v745_v9 = vmax.f32 %v741_v32, 0.0  ;;  %v1216_v32 = vld [vmem:[#allocation11 + $0x48] sm:$0xff] }
 0x229   :  { %v2352_v52 = vpop.f32.mrf.mxu0 }
 0x22a   :  { %v2353_v63 = vadd.f32 %v2352_v52, %v2351_v50  ;;  %v742_v0 = vadd.f32 %v2241_v62, %v721_v58  ;;  %v1219_v50 = vld [vmem:[#allocation11 + $0x60] sm:$0xff]  ;;  %v1234_v52 = vld [vmem:[#allocation11 + $0xd8] sm:$0xff] }
 0x22b   :  { %v2354_v53 = vpop.f32.mrf.mxu0  ;;  %v1250_v58 = vld [vmem:[#allocation11 + $0x158] sm:$0xff] }
 0x22c   :  { %v726_v3 = vadd.f32 %v2353_v63, %v725_v2  ;;  %v746_v7 = vmax.f32 %v742_v0, 0.0  ;;  %v1217_v63 = vld [vmem:[#allocation11 + $0x50] sm:$0xff]  ;;  %v1232_v0 = vld [vmem:[#allocation11 + $0xc8] sm:$0xff] }
 0x22d   :  { %v2355_v56 = vpop.f32.mrf.mxu0  ;;  %v1244_v2 = vld [vmem:[#allocation11 + $0x128] sm:$0xff] }
 0x22e   :  { %v2356_v60 = vadd.f32 %v2355_v56, %v2354_v53  ;;  %v743_v12 = vadd.f32 %v2241_v62, %v726_v3  ;;  %v1218_v56 = vld [vmem:[#allocation11 + $0x58] sm:$0xff]  ;;  %v1215_v3 = vld [vmem:[#allocation11 + $0x40] sm:$0xff] }
 0x230   :  { %v731_v5 = vadd.f32 %v2765_v61, %v2356_v60  ;;  %v747_v20 = vmax.f32 %v743_v12, 0.0  ;;  %v1248_v60 = vld [vmem:[#allocation11 + $0x148] sm:$0xff]  ;;  %v1247_v61 = vld [vmem:[#allocation11 + $0x140] sm:$0xff]  ;;  %v1241_v12 = vld [vmem:[#allocation11 + $0x110] sm:$0xff] }
 0x232   :  { %v744_v10 = vadd.f32 %v2241_v62, %v731_v5  ;;  %v1246_v62 = vld [vmem:[#allocation11 + $0x138] sm:$0xff]  ;;  %v1231_v5 = vld [vmem:[#allocation11 + $0xc0] sm:$0xff] }
 0x234   :  { %v748_v18 = vmax.f32 %v744_v10, 0.0  ;;  %v1213_v10 = vld [vmem:[#allocation11 + $0x30] sm:$0xff] }
 0x23f   :  { %v2800_v4 = vpop.f32.mrf.mxu0 }
 0x240   :  { %v858_v6 = vadd.f32 %v2800_v4, %v2242_v51  ;;  %v1230_v4 = vld [vmem:[#allocation11 + $0xb8] sm:$0xff] }
 0x241   :  { %v831_v8 = vpop.f32.mrf.mxu0 }
 0x242   :  { %v857_v11 = vadd.f32 %v2242_v51, %v831_v8  ;;  %v862_v13 = vadd.f32 %v858_v6, %v746_v7  ;;  %v1243_v6 = vld [vmem:[#allocation11 + $0x120] sm:$0xff]  ;;  %v1214_v7 = vld [vmem:[#allocation11 + $0x38] sm:$0xff]  ;;  %v1229_v8 = vld [vmem:[#allocation11 + $0xb0] sm:$0xff] }
 0x243   :  { %v2803_v14 = vpop.f32.mrf.mxu0 }
 0x244   :  { %v861_v15 = vadd.f32 %v857_v11, %v745_v9  ;;  %v860_v16 = vadd.f32 %v2803_v14, %v2242_v51  ;;  %v3493_v21 = vmax.f32 %v862_v13, 0.0  ;;  %v1242_v9 = vld [vmem:[#allocation11 + $0x118] sm:$0xff]  ;;  %v1228_v11 = vld [vmem:[#allocation11 + $0xa8] sm:$0xff]  ;;  %v1227_v14 = vld [vmem:[#allocation11 + $0xa0] sm:$0xff] }
 0x245   :  { %v841_v17 = vpop.f32.mrf.mxu0  ;;  %v1212_v13 = vld [vmem:[#allocation11 + $0x28] sm:$0xff] }
 0x246   :  { %v3491_v19 = vmax.f32 %v861_v15, 0.0  ;;  %v859_v22 = vadd.f32 %v2242_v51, %v841_v17  ;;  %v864_v25 = vadd.f32 %v860_v16, %v748_v18  ;;  %v893_v36 = vrot.slane %v3493_v21, 6  ;;  %v1245_v51 = vld [vmem:[#allocation11 + $0x130] sm:$0xff]  ;;  %v1240_v15 = vld [vmem:[#allocation11 + $0x108] sm:$0xff]  ;;  %v1211_v16 = vld [vmem:[#allocation11 + $0x20] sm:$0xff] }
 0x247   :  { %v877_v43 = vrot.slane %v3493_v21, 4  ;;  %v1226_v17 = vld [vmem:[#allocation11 + $0x98] sm:$0xff]  ;;  %v1239_v18 = vld [vmem:[#allocation11 + $0x100] sm:$0xff] }
 0x248   :  { %v876_v23 = vrot.slane %v3491_v19, 4  ;;  %v892_v24 = vrot.slane %v3491_v19, 6  ;;  %2836 = vmatprep.mubr.f32.mxu0 %v3491_v19  ;;  %v863_v27 = vadd.f32 %v859_v22, %v747_v20  ;;  %v3501_v30 = vmax.f32 %v864_v25, 0.0  ;;  %v1210_v20 = vld [vmem:[#allocation11 + $0x18] sm:$0xff]  ;;  %v1225_v22 = vld [vmem:[#allocation11 + $0x90] sm:$0xff]  ;;  %v1208_v25 = vld [vmem:[#allocation11 + $0x8] sm:$0xff] }
 0x249   :  { %2837 = vmatmul.mubr.f32.vlgmr.msra.gmra.mxu0 %v3493_v21 }
 0x24a   :  { %886 = vst [vmem:[#allocation2 + $0x20] sm:$0xf0] %v876_v23  ;;  %902 = vst [vmem:[#allocation2 + $0x40] sm:$0xfc] %v892_v24  ;;  %2843 = vmatpush3.msra.mxu0 %v1254_v45  ;;  %v3499_v29 = vmax.f32 %v863_v27, 0.0  ;;  %v894_v41 = vsel %vm183_vm1, %v892_v24, %v893_v36  ;;  %v1220_v45 = vld [vmem:[#allocation11 + $0x68] sm:$0xff]  ;;  %v878_v46 = vsel %vm875_vm2, %v876_v23, %v877_v43 }
 0x24b   :  { %2844 = vmatprep.subr.mxu0 %v1253_v26  ;;  %v896_v53 = vrot.slane %v3501_v30, 6  ;;  %v880_v55 = vrot.slane %v3501_v30, 4  ;;  %v1209_v23 = vld [vmem:[#allocation11 + $0x10] sm:$0xff]  ;;  %v1224_v24 = vld [vmem:[#allocation11 + $0x88] sm:$0xff]  ;;  %v1207_v27 = vld [vmem:[#allocation11] sm:$0xff] }
 0x24c   :  { %2845 = vmatpush3.msra.mxu0 %v1253_v26  ;;  %v879_v33 = vrot.slane %v3499_v29, 4  ;;  %v895_v34 = vrot.slane %v3499_v29, 6  ;;  %2839 = vmatprep.mubr.f32.mxu0 %v3499_v29  ;;  %v1223_v26 = vld [vmem:[#allocation11 + $0x80] sm:$0xff] }
 0x24d   :  { %2846 = vmatprep.subr.mxu0 %v1252_v28  ;;  %2840 = vmatmul.mubr.f32.gmra.mxu0 %v3501_v30 }
 0x24e   :  { %888 = vst [vmem:[#allocation2] sm:$0xf0] %v879_v33  ;;  %904 = vst [vmem:[#allocation2 + $0x8] sm:$0xfc] %v895_v34  ;;  %2847 = vmatpush3.msra.mxu0 %v1252_v28  ;;  %v897_v54 = vsel %vm183_vm1, %v895_v34, %v896_v53  ;;  %v881_v31 = vsel %vm875_vm2, %v879_v33, %v880_v55  ;;  %v1455_v28 = vld [vmem:[#allocation12 + $0x78] sm:$0xff] }
 0x24f   :  { %2848 = vmatprep.subr.mxu0 %v1251_v35 }
 0x250   :  { %2849 = vmatpush3.msra.mxu0 %v1251_v35 }
 0x251   :  { %v911_v37 = vld [vmem:[#allocation2 + $0x40] sm:$0xff]  ;;  %2850 = vmatprep.subr.mxu0 %v1250_v58 }
 0x252   :  { %v910_v38 = vld [vmem:[#allocation2 + $0x20] sm:$0xff]  ;;  %1034 = vmatprep.mubr.f32.mxu1 %v911_v37  ;;  %1175 = vst [vmem:[#allocation2 + $0x40] sm:$0x3] %v3221_v1  ;;  %2851 = vmatpush3.msra.mxu0 %v1250_v58 }
 0x253   :  { %1155 = vst [vmem:[#allocation2 + $0x20] sm:$0xf] %v3221_v1  ;;  %1035 = vmatmul.mubr.f32.vlgmr.msra.gmra.mxu1 %v910_v38  ;;  %2852 = vmatprep.subr.mxu0 %v1249_v59  ;;  %v2243_v38 = vld [vmem:[%s3654_s8] ss:$0 sm:$0xff] }
 0x254   :  { %1039 = vmatprep.mubr.f32.mxu1 %v894_v41  ;;  %2462 = vmatpush3.msra.mxu1 %v1222_v39 }
 0x255   :  { %2463 = vmatprep.subr.mxu1 %v1237_v40  ;;  %v917_v47 = vld [vmem:[#allocation2 + $0x8] sm:$0xff]  ;;  %v916_v48 = vld [vmem:[#allocation2] sm:$0xff]  ;;  %2853 = vmatpush3.msra.mxu0 %v1249_v59 }
 0x256   :  { %2464 = vmatpush3.msra.mxu1 %v1221_v42  ;;  %1176 = vst [vmem:[#allocation2 + $0x8] sm:$0x3] %v3221_v1  ;;  %1156 = vst [vmem:[#allocation2] sm:$0xf] %v3221_v1  ;;  %2854 = vmatprep.subr.mxu0 %v1248_v60 }
 0x257   :  { %1040 = vmatmul.mubr.f32.gmra.mxu1 %v878_v46  ;;  %2465 = vmatprep.subr.mxu1 %v1236_v44 }
 0x258   :  { %1044 = vmatprep.mubr.f32.mxu1 %v917_v47  ;;  %2466 = vmatpush3.msra.mxu1 %v1220_v45 }
 0x259   :  { %2467 = vmatprep.subr.mxu1 %v1235_v49  ;;  %2855 = vmatpush3.msra.mxu0 %v1248_v60 }
 0x25a   :  { %2468 = vmatpush3.msra.mxu1 %v1219_v50  ;;  %2856 = vmatprep.subr.mxu0 %v1247_v61 }
 0x25b   :  { %1045 = vmatmul.mubr.f32.gmra.mxu1 %v916_v48  ;;  %2469 = vmatprep.subr.mxu1 %v1234_v52 }
 0x25c   :  { %1049 = vmatprep.mubr.f32.mxu1 %v897_v54  ;;  %2470 = vmatpush3.msra.mxu1 %v1218_v56 }
 0x25d   :  { %2471 = vmatprep.subr.mxu1 %v1233_v57  ;;  %2857 = vmatpush3.msra.mxu0 %v1247_v61 }
 0x25e   :  { %2858 = vmatprep.subr.mxu0 %v1246_v62  ;;  %2472 = vmatpush3.msra.mxu1 %v1217_v63 }
 0x25f   :  { %1050 = vmatmul.mubr.f32.gmra.mxu1 %v881_v31  ;;  %2859 = vmatpush3.msra.mxu0 %v1246_v62 }
 0x260   :  { %2473 = vmatprep.subr.mxu1 %v1232_v0  ;;  %2860 = vmatprep.subr.mxu0 %v1245_v51 }
 0x261   :  { %2474 = vmatpush3.msra.mxu1 %v1216_v32  ;;  %2861 = vmatpush3.msra.mxu0 %v1245_v51 }
 0x262   :  { %2475 = vmatprep.subr.mxu1 %v1231_v5  ;;  %2862 = vmatprep.subr.mxu0 %v1244_v2 }
 0x263   :  { %2476 = vmatpush3.msra.mxu1 %v1215_v3  ;;  %2863 = vmatpush3.msra.mxu0 %v1244_v2 }
 0x264   :  { %2477 = vmatprep.subr.mxu1 %v1230_v4  ;;  %2864 = vmatprep.subr.mxu0 %v1243_v6  ;;  %v1454_v4 = vld [vmem:[#allocation12 + $0x70] sm:$0xff] }
 0x265   :  { %2478 = vmatpush3.msra.mxu1 %v1214_v7  ;;  %2865 = vmatpush3.msra.mxu0 %v1243_v6  ;;  %v1453_v7 = vld [vmem:[#allocation12 + $0x68] sm:$0xff] }
 0x266   :  { %2479 = vmatprep.subr.mxu1 %v1229_v8  ;;  %2866 = vmatprep.subr.mxu0 %v1242_v9 }
 0x267   :  { %2480 = vmatpush3.msra.mxu1 %v1213_v10  ;;  %2867 = vmatpush3.msra.mxu0 %v1242_v9  ;;  %v1452_v9 = vld [vmem:[#allocation12 + $0x60] sm:$0xff] }
 0x268   :  { %2481 = vmatprep.subr.mxu1 %v1228_v11  ;;  %2868 = vmatprep.subr.mxu0 %v1241_v12  ;;  %v1451_v11 = vld [vmem:[#allocation12 + $0x58] sm:$0xff] }
 0x269   :  { %2482 = vmatpush3.msra.mxu1 %v1212_v13  ;;  %2869 = vmatpush3.msra.mxu0 %v1241_v12 }
 0x26a   :  { %2483 = vmatprep.subr.mxu1 %v1227_v14  ;;  %2870 = vmatprep.subr.mxu0 %v1240_v15 }
 0x26b   :  { %2484 = vmatpush3.msra.mxu1 %v1211_v16  ;;  %2871 = vmatpush3.msra.mxu0 %v1240_v15  ;;  %v1450_v15 = vld [vmem:[#allocation12 + $0x50] sm:$0xff] }
 0x26c   :  { %2485 = vmatprep.subr.mxu1 %v1226_v17  ;;  %2872 = vmatprep.subr.mxu0 %v1239_v18  ;;  %v1449_v17 = vld [vmem:[#allocation12 + $0x48] sm:$0xff] }
 0x26d   :  { %2486 = vmatpush3.msra.mxu1 %v1210_v20  ;;  %2873 = vmatpush3.msra.mxu0 %v1239_v18  ;;  %v1448_v20 = vld [vmem:[#allocation12 + $0x40] sm:$0xff] }
 0x26e   :  { %2487 = vmatprep.subr.mxu1 %v1225_v22  ;;  %v1447_v22 = vld [vmem:[#allocation12 + $0x38] sm:$0xff] }
 0x26f   :  { %2488 = vmatpush3.msra.mxu1 %v1209_v23  ;;  %v1446_v23 = vld [vmem:[#allocation12 + $0x30] sm:$0xff] }
 0x270   :  { %2489 = vmatprep.subr.mxu1 %v1224_v24  ;;  %v1445_v24 = vld [vmem:[#allocation12 + $0x28] sm:$0xff] }
 0x271   :  { %2490 = vmatpush3.msra.mxu1 %v1208_v25  ;;  %v1444_v25 = vld [vmem:[#allocation12 + $0x20] sm:$0xff] }
 0x272   :  { %2491 = vmatprep.subr.mxu1 %v1223_v26  ;;  %v1443_v26 = vld [vmem:[#allocation12 + $0x18] sm:$0xff] }
 0x273   :  { %2492 = vmatpush3.msra.mxu1 %v1207_v27  ;;  %v1442_v27 = vld [vmem:[#allocation12 + $0x10] sm:$0xff] }
 0x274   :  { %2880 = vmatprep.subr.mxu1 %v1455_v28 }
 0x309   :  { %v2838_v33 = vpop.f32.mrf.mxu0 }
 0x30b   :  { %v1121_v37 = vpop.f32.mrf.mxu0 }
 0x30d   :  { %v2841_v44 = vpop.f32.mrf.mxu0 }
 0x30f   :  { %v1131_v54 = vpop.f32.mrf.mxu0 }
 0x313   :  { %v2429_v34 = vpop.f32.mrf.mxu1 }
 0x315   :  { %v2430_v35 = vpop.f32.mrf.mxu1 }
 0x316   :  { %v2431_v36 = vadd.f32 %v2430_v35, %v2429_v34  ;;  %v1646_v34 = vld [vmem:[#allocation14 + $0x170] sm:$0xff]  ;;  %v1645_v35 = vld [vmem:[#allocation14 + $0x168] sm:$0xff] }
 0x317   :  { %v2432_v39 = vpop.f32.mrf.mxu1 }
 0x318   :  { %v1122_v40 = vadd.f32 %v2431_v36, %v1121_v37  ;;  %v1644_v36 = vld [vmem:[#allocation14 + $0x160] sm:$0xff]  ;;  %v1643_v37 = vld [vmem:[#allocation14 + $0x158] sm:$0xff] }
 0x319   :  { %v2433_v41 = vpop.f32.mrf.mxu1 }
 0x31a   :  { %v1147_v42 = vadd.f32 %v2243_v38, %v1122_v40  ;;  %v2434_v43 = vadd.f32 %v2433_v41, %v2432_v39  ;;  %v1630_v39 = vld [vmem:[#allocation14 + $0xf0] sm:$0xff]  ;;  %v1613_v40 = vld [vmem:[#allocation14 + $0x68] sm:$0xff] }
 0x31b   :  { %v2435_v45 = vpop.f32.mrf.mxu1  ;;  %v1642_v41 = vld [vmem:[#allocation14 + $0x150] sm:$0xff] }
 0x31c   :  { %v1151_v46 = vmax.f32 %v1147_v42, 0.0  ;;  %v1127_v47 = vadd.f32 %v2838_v33, %v2434_v43  ;;  %v1647_v33 = vld [vmem:[#allocation14 + $0x178] sm:$0xff]  ;;  %v1628_v42 = vld [vmem:[#allocation14 + $0xe0] sm:$0xff]  ;;  %v1641_v43 = vld [vmem:[#allocation14 + $0x148] sm:$0xff] }
 0x31d   :  { %v2436_v48 = vpop.f32.mrf.mxu1 }
 0x31e   :  { %v1161_v49 = vrot.slane %v1151_v46, 4  ;;  %v1177_v50 = vrot.slane %v1151_v46, 6  ;;  %v1148_v52 = vadd.f32 %v2243_v38, %v1127_v47  ;;  %v2437_v53 = vadd.f32 %v2436_v48, %v2435_v45  ;;  %2874 = vmatprep.mubr.f32.mxu0 %v1151_v46  ;;  %v1640_v45 = vld [vmem:[#allocation14 + $0x140] sm:$0xff]  ;;  %v1627_v46 = vld [vmem:[#allocation14 + $0xd8] sm:$0xff] }
 0x31f   :  { %v2438_v55 = vpop.f32.mrf.mxu1  ;;  %v1611_v47 = vld [vmem:[#allocation14 + $0x58] sm:$0xff] }
 0x320   :  { %1171 = vst [vmem:[#allocation2 + $0x20] sm:$0xf0] %v1161_v49  ;;  %1187 = vst [vmem:[#allocation2 + $0x40] sm:$0xfc] %v1177_v50  ;;  %v1152_v31 = vmax.f32 %v1148_v52, 0.0  ;;  %v1132_v56 = vadd.f32 %v2437_v53, %v1131_v54  ;;  %v1639_v48 = vld [vmem:[#allocation14 + $0x138] sm:$0xff] }
 0x321   :  { %v2439_v57 = vpop.f32.mrf.mxu1  ;;  %v1638_v52 = vld [vmem:[#allocation14 + $0x130] sm:$0xff]  ;;  %v1637_v53 = vld [vmem:[#allocation14 + $0x128] sm:$0xff] }
 0x322   :  { %v1149_v58 = vadd.f32 %v2243_v38, %v1132_v56  ;;  %v2440_v59 = vadd.f32 %v2439_v57, %v2438_v55  ;;  %2875 = vmatmul.mubr.f32.vlgmr.msra.gmra.mxu0 %v1152_v31  ;;  %v1178_v62 = vrot.slane %v1152_v31, 6  ;;  %v1162_v2 = vrot.slane %v1152_v31, 4  ;;  %v1625_v54 = vld [vmem:[#allocation14 + $0xc8] sm:$0xff]  ;;  %v1636_v31 = vld [vmem:[#allocation14 + $0x120] sm:$0xff] }
 0x323   :  { %v1609_v55 = vld [vmem:[#allocation14 + $0x48] sm:$0xff]  ;;  %v1624_v56 = vld [vmem:[#allocation14 + $0xc0] sm:$0xff] }
 0x324   :  { %v1153_v60 = vmax.f32 %v1149_v58, 0.0  ;;  %v1137_v61 = vadd.f32 %v2841_v44, %v2440_v59  ;;  %v1179_v6 = vsel %vm183_vm1, %v1177_v50, %v1178_v62  ;;  %v1163_v8 = vsel %vm875_vm2, %v1161_v49, %v1162_v2  ;;  %v1612_v44 = vld [vmem:[#allocation14 + $0x60] sm:$0xff]  ;;  %v1626_v49 = vld [vmem:[#allocation14 + $0xd0] sm:$0xff]  ;;  %v1635_v58 = vld [vmem:[#allocation14 + $0x118] sm:$0xff] }
 0x325   :  { %v1610_v50 = vld [vmem:[#allocation14 + $0x50] sm:$0xff]  ;;  %v1608_v57 = vld [vmem:[#allocation14 + $0x40] sm:$0xff]  ;;  %v1623_v59 = vld [vmem:[#allocation14 + $0xb8] sm:$0xff] }
 0x326   :  { %v1164_v63 = vrot.slane %v1153_v60, 4  ;;  %v1180_v0 = vrot.slane %v1153_v60, 6  ;;  %v1150_v51 = vadd.f32 %v2243_v38, %v1137_v61  ;;  %2877 = vmatprep.mubr.f32.mxu0 %v1153_v60  ;;  %v1631_v38 = vld [vmem:[#allocation14 + $0xf8] sm:$0xff]  ;;  %v1634_v61 = vld [vmem:[#allocation14 + $0x110] sm:$0xff]  ;;  %v1620_v2 = vld [vmem:[#allocation14 + $0xa0] sm:$0xff] }
 0x327   :  { %v1196_v32 = vld [vmem:[#allocation2 + $0x40] sm:$0xff]  ;;  %2545 = vmatprep.subr.mxu0 %v1631_v38  ;;  %v1622_v62 = vld [vmem:[#allocation14 + $0xb0] sm:$0xff] }
 0x328   :  { %v1195_v5 = vld [vmem:[#allocation2 + $0x20] sm:$0xff]  ;;  %1173 = vst [vmem:[#allocation2] sm:$0xf0] %v1164_v63  ;;  %1189 = vst [vmem:[#allocation2 + $0x8] sm:$0xfc] %v1180_v0  ;;  %v1154_v3 = vmax.f32 %v1150_v51, 0.0  ;;  %1319 = vmatprep.mubr.f32.mxu1 %v1196_v32 }
 0x329   :  { %1564 = vst [vmem:[#allocation2 + $0x40] sm:$0xf] %v3221_v1  ;;  %1833 = vst [vmem:[#allocation2 + $0x20] sm:$0xff] %v3221_v1  ;;  %1320 = vmatmul.mubr.f32.vlgmr.msra.gmra.mxu1 %v1195_v5  ;;  %v1607_v60 = vld [vmem:[#allocation14 + $0x38] sm:$0xff]  ;;  %v1621_v51 = vld [vmem:[#allocation14 + $0xa8] sm:$0xff] }
 0x32a   :  { %2881 = vmatpush3.msra.mxu1 %v1455_v28  ;;  %1324 = vmatprep.mubr.f32.mxu1 %v1179_v6  ;;  %v1181_v10 = vrot.slane %v1154_v3, 6  ;;  %v1165_v14 = vrot.slane %v1154_v3, 4  ;;  %v1441_v28 = vld [vmem:[#allocation12 + $0x8] sm:$0xff]  ;;  %v1632_v5 = vld [vmem:[#allocation14 + $0x100] sm:$0xff]  ;;  %v1603_v6 = vld [vmem:[#allocation14 + $0x18] sm:$0xff] }
 0x32b   :  { %2882 = vmatprep.subr.mxu1 %v1454_v4  ;;  %2878 = vmatmul.mubr.f32.gmra.mxu0 %v1154_v3  ;;  %v1605_v32 = vld [vmem:[#allocation14 + $0x28] sm:$0xff]  ;;  %v1604_v3 = vld [vmem:[#allocation14 + $0x20] sm:$0xff] }
 0x32c   :  { %2883 = vmatpush3.msra.mxu1 %v1454_v4  ;;  %v1182_v16 = vsel %vm183_vm1, %v1180_v0, %v1181_v10  ;;  %v1166_v18 = vsel %vm875_vm2, %v1164_v63, %v1165_v14  ;;  %v1606_v63 = vld [vmem:[#allocation14 + $0x30] sm:$0xff]  ;;  %v1633_v0 = vld [vmem:[#allocation14 + $0x108] sm:$0xff]  ;;  %v1619_v4 = vld [vmem:[#allocation14 + $0x98] sm:$0xff] }
 0x32d   :  { %2884 = vmatprep.subr.mxu1 %v1453_v7  ;;  %1325 = vmatmul.mubr.f32.gmra.mxu1 %v1163_v8  ;;  %v1602_v8 = vld [vmem:[#allocation14 + $0x10] sm:$0xff]  ;;  %v1601_v10 = vld [vmem:[#allocation14 + $0x8] sm:$0xff]  ;;  %v1920_v14 = vld [vmem:[#allocation15 + $0x178] sm:$0xff] }
 0x32e   :  { %2885 = vmatpush3.msra.mxu1 %v1453_v7  ;;  %v1618_v7 = vld [vmem:[#allocation14 + $0x90] sm:$0xff] }
 0x32f   :  { %2886 = vmatprep.subr.mxu1 %v1452_v9  ;;  %v1202_v12 = vld [vmem:[#allocation2 + $0x8] sm:$0xff]  ;;  %v1201_v13 = vld [vmem:[#allocation2] sm:$0xff] }
 0x330   :  { %2887 = vmatpush3.msra.mxu1 %v1452_v9  ;;  %1329 = vmatprep.mubr.f32.mxu1 %v1202_v12  ;;  %1565 = vst [vmem:[#allocation2 + $0x8] sm:$0xf] %v3221_v1  ;;  %1834 = vst [vmem:[#allocation2] sm:$0xff] %v3221_v1  ;;  %v1617_v9 = vld [vmem:[#allocation14 + $0x88] sm:$0xff]  ;;  %v1600_v12 = vld [vmem:[#allocation14] sm:$0xff] }
 0x331   :  { %2888 = vmatprep.subr.mxu1 %v1451_v11  ;;  %1330 = vmatmul.mubr.f32.gmra.mxu1 %v1201_v13  ;;  %v1904_v13 = vld [vmem:[#allocation15 + $0xf8] sm:$0xff] }
 0x332   :  { %2889 = vmatpush3.msra.mxu1 %v1451_v11  ;;  %1334 = vmatprep.mubr.f32.mxu1 %v1182_v16  ;;  %v1616_v11 = vld [vmem:[#allocation14 + $0x80] sm:$0xff] }
 0x333   :  { %2890 = vmatprep.subr.mxu1 %v1450_v15 }
 0x334   :  { %2891 = vmatpush3.msra.mxu1 %v1450_v15 }
 0x335   :  { %2892 = vmatprep.subr.mxu1 %v1449_v17  ;;  %1335 = vmatmul.mubr.f32.gmra.mxu1 %v1166_v18 }
 0x336   :  { %2893 = vmatpush3.msra.mxu1 %v1449_v17  ;;  %2912 = vmatprep.mubr.f32.mxu1 %v3491_v19  ;;  %v1440_v19 = vld [vmem:[#allocation12] sm:$0xff] }
 0x337   :  { %2894 = vmatprep.subr.mxu1 %v1448_v20 }
 0x338   :  { %2895 = vmatpush3.msra.mxu1 %v1448_v20 }
 0x339   :  { %2896 = vmatprep.subr.mxu1 %v1447_v22 }
 0x33a   :  { %2897 = vmatpush3.msra.mxu1 %v1447_v22 }
 0x33b   :  { %2898 = vmatprep.subr.mxu1 %v1446_v23 }
 0x33c   :  { %2899 = vmatpush3.msra.mxu1 %v1446_v23 }
 0x33d   :  { %2900 = vmatprep.subr.mxu1 %v1445_v24 }
 0x33e   :  { %2901 = vmatpush3.msra.mxu1 %v1445_v24 }
 0x33f   :  { %2902 = vmatprep.subr.mxu1 %v1444_v25 }
 0x340   :  { %2903 = vmatpush3.msra.mxu1 %v1444_v25 }
 0x341   :  { %2904 = vmatprep.subr.mxu1 %v1443_v26 }
 0x342   :  { %2905 = vmatpush3.msra.mxu1 %v1443_v26 }
 0x343   :  { %2906 = vmatprep.subr.mxu1 %v1442_v27 }
 0x344   :  { %2907 = vmatpush3.msra.mxu1 %v1442_v27 }
 0x345   :  { %2908 = vmatprep.subr.mxu1 %v1441_v28 }
 0x346   :  { %2909 = vmatpush3.msra.mxu1 %v1441_v28 }
 0x347   :  { %2910 = vmatprep.subr.mxu1 %v1440_v19 }
 0x348   :  { %2911 = vmatpush3.msra.mxu1 %v1440_v19 }
 0x349   :  { %2913 = vmatmul.mubr.f32.vlgmr.msra.gmra.mxu1 %v3493_v21  ;;  %2918 = vmatprep.subr.mxu1 %v1647_v33  ;;  %v1615_v21 = vld [vmem:[#allocation14 + $0x78] sm:$0xff] }
 0x34a   :  { %2915 = vmatprep.mubr.f32.mxu1 %v3499_v29  ;;  %2919 = vmatpush3.msra.mxu1 %v1647_v33  ;;  %v1614_v29 = vld [vmem:[#allocation14 + $0x70] sm:$0xff] }
 0x34b   :  { %2920 = vmatprep.subr.mxu1 %v1646_v34  ;;  %2546 = vmatpush3.msra.mxu0 %v1615_v21 }
 0x34c   :  { %2921 = vmatpush3.msra.mxu1 %v1646_v34  ;;  %2547 = vmatprep.subr.mxu0 %v1630_v39 }
 0x34d   :  { %2916 = vmatmul.mubr.f32.gmra.mxu1 %v3501_v30  ;;  %2922 = vmatprep.subr.mxu1 %v1645_v35  ;;  %v1629_v30 = vld [vmem:[#allocation14 + $0xe8] sm:$0xff] }
 0x34e   :  { %2923 = vmatpush3.msra.mxu1 %v1645_v35  ;;  %2548 = vmatpush3.msra.mxu0 %v1614_v29  ;;  %v2245_v29 = vld [vmem:[%s3658_s12] ss:$0 sm:$0xff] }
 0x34f   :  { %2924 = vmatprep.subr.mxu1 %v1644_v36  ;;  %2549 = vmatprep.subr.mxu0 %v1629_v30 }
 0x350   :  { %2925 = vmatpush3.msra.mxu1 %v1644_v36  ;;  %2550 = vmatpush3.msra.mxu0 %v1613_v40 }
 0x351   :  { %2926 = vmatprep.subr.mxu1 %v1643_v37  ;;  %2551 = vmatprep.subr.mxu0 %v1628_v42 }
 0x352   :  { %2927 = vmatpush3.msra.mxu1 %v1643_v37  ;;  %2552 = vmatpush3.msra.mxu0 %v1612_v44  ;;  %v2244_v37 = vld [vmem:[%s3656_s10] ss:$0 sm:$0xff] }
 0x353   :  { %2928 = vmatprep.subr.mxu1 %v1642_v41  ;;  %2553 = vmatprep.subr.mxu0 %v1627_v46 }
 0x354   :  { %2929 = vmatpush3.msra.mxu1 %v1642_v41  ;;  %2554 = vmatpush3.msra.mxu0 %v1611_v47 }
 0x355   :  { %2930 = vmatprep.subr.mxu1 %v1641_v43  ;;  %2555 = vmatprep.subr.mxu0 %v1626_v49 }
 0x356   :  { %2931 = vmatpush3.msra.mxu1 %v1641_v43  ;;  %2556 = vmatpush3.msra.mxu0 %v1610_v50 }
 0x357   :  { %2932 = vmatprep.subr.mxu1 %v1640_v45  ;;  %2557 = vmatprep.subr.mxu0 %v1625_v54 }
 0x358   :  { %2933 = vmatpush3.msra.mxu1 %v1640_v45  ;;  %2558 = vmatpush3.msra.mxu0 %v1609_v55 }
 0x359   :  { %2934 = vmatprep.subr.mxu1 %v1639_v48  ;;  %2559 = vmatprep.subr.mxu0 %v1624_v56 }
 0x35a   :  { %2935 = vmatpush3.msra.mxu1 %v1639_v48  ;;  %2560 = vmatpush3.msra.mxu0 %v1608_v57 }
 0x35b   :  { %2936 = vmatprep.subr.mxu1 %v1638_v52  ;;  %2561 = vmatprep.subr.mxu0 %v1623_v59 }
 0x35c   :  { %2937 = vmatpush3.msra.mxu1 %v1638_v52  ;;  %2562 = vmatpush3.msra.mxu0 %v1607_v60 }
 0x35d   :  { %2938 = vmatprep.subr.mxu1 %v1637_v53  ;;  %2563 = vmatprep.subr.mxu0 %v1622_v62  ;;  %v1919_v62 = vld [vmem:[#allocation15 + $0x170] sm:$0xff] }
 0x35e   :  { %2939 = vmatpush3.msra.mxu1 %v1637_v53  ;;  %2564 = vmatpush3.msra.mxu0 %v1606_v63 }
 0x35f   :  { %2940 = vmatprep.subr.mxu1 %v1636_v31  ;;  %2565 = vmatprep.subr.mxu0 %v1621_v51 }
 0x360   :  { %2941 = vmatpush3.msra.mxu1 %v1636_v31  ;;  %2566 = vmatpush3.msra.mxu0 %v1605_v32 }
 0x361   :  { %2942 = vmatprep.subr.mxu1 %v1635_v58  ;;  %2567 = vmatprep.subr.mxu0 %v1620_v2 }
 0x362   :  { %2943 = vmatpush3.msra.mxu1 %v1635_v58  ;;  %2568 = vmatpush3.msra.mxu0 %v1604_v3 }
 0x363   :  { %2944 = vmatprep.subr.mxu1 %v1634_v61  ;;  %2569 = vmatprep.subr.mxu0 %v1619_v4  ;;  %v1888_v4 = vld [vmem:[#allocation15 + $0x78] sm:$0xff] }
 0x364   :  { %2945 = vmatpush3.msra.mxu1 %v1634_v61  ;;  %2570 = vmatpush3.msra.mxu0 %v1603_v6  ;;  %v1903_v6 = vld [vmem:[#allocation15 + $0xf0] sm:$0xff] }
 0x365   :  { %2946 = vmatprep.subr.mxu1 %v1633_v0  ;;  %2571 = vmatprep.subr.mxu0 %v1618_v7 }
 0x366   :  { %2947 = vmatpush3.msra.mxu1 %v1633_v0  ;;  %2572 = vmatpush3.msra.mxu0 %v1602_v8  ;;  %v1918_v0 = vld [vmem:[#allocation15 + $0x168] sm:$0xff]  ;;  %v1887_v8 = vld [vmem:[#allocation15 + $0x70] sm:$0xff] }
 0x367   :  { %2948 = vmatprep.subr.mxu1 %v1632_v5  ;;  %2573 = vmatprep.subr.mxu0 %v1617_v9  ;;  %v1902_v9 = vld [vmem:[#allocation15 + $0xe8] sm:$0xff] }
 0x368   :  { %2949 = vmatpush3.msra.mxu1 %v1632_v5  ;;  %2574 = vmatpush3.msra.mxu0 %v1601_v10  ;;  %v1917_v5 = vld [vmem:[#allocation15 + $0x160] sm:$0xff] }
 0x369   :  { %2575 = vmatprep.subr.mxu0 %v1616_v11  ;;  %2956 = vmatprep.subr.mxu1 %v1920_v14  ;;  %v1886_v11 = vld [vmem:[#allocation15 + $0x68] sm:$0xff] }
 0x36a   :  { %2576 = vmatpush3.msra.mxu0 %v1600_v12  ;;  %v1901_v12 = vld [vmem:[#allocation15 + $0xe0] sm:$0xff] }
 0x36b   :  { %2609 = vmatprep.subr.mxu0 %v1904_v13  ;;  %v1885_v13 = vld [vmem:[#allocation15 + $0x60] sm:$0xff] }
 0x3e2   :  { %v2876_v24 = vpop.f32.mrf.mxu0 }
 0x3e4   :  { %v1406_v28 = vpop.f32.mrf.mxu0 }
 0x3e9   :  { %v2493_v15 = vpop.f32.mrf.mxu1 }
 0x3eb   :  { %v2494_v16 = vpop.f32.mrf.mxu1  ;;  %v2879_v33 = vpop.f32.mrf.mxu0 }
 0x3ec   :  { %v2495_v26 = vadd.f32 %v2494_v16, %v2493_v15  ;;  %v1900_v16 = vld [vmem:[#allocation15 + $0xd8] sm:$0xff] }
 0x3ed   :  { %v2496_v17 = vpop.f32.mrf.mxu1  ;;  %v1416_v21 = vpop.f32.mrf.mxu0 }
 0x3ee   :  { %v1407_v35 = vadd.f32 %v2495_v26, %v1406_v28  ;;  %v1883_v26 = vld [vmem:[#allocation15 + $0x50] sm:$0xff]  ;;  %v1898_v28 = vld [vmem:[#allocation15 + $0xc8] sm:$0xff] }
 0x3ef   :  { %v2497_v18 = vpop.f32.mrf.mxu1 }
 0x3f0   :  { %v2498_v25 = vadd.f32 %v2497_v18, %v2496_v17  ;;  %v1432_v30 = vadd.f32 %v2244_v37, %v1407_v35  ;;  %v1884_v17 = vld [vmem:[#allocation15 + $0x58] sm:$0xff]  ;;  %v1881_v35 = vld [vmem:[#allocation15 + $0x40] sm:$0xff] }
 0x3f1   :  { %v2499_v20 = vpop.f32.mrf.mxu1  ;;  %v1916_v18 = vld [vmem:[#allocation15 + $0x158] sm:$0xff] }
 0x3f2   :  { %v1412_v19 = vadd.f32 %v2876_v24, %v2498_v25  ;;  %v1436_v46 = vmax.f32 %v1432_v30, 0.0  ;;  %v1912_v24 = vld [vmem:[#allocation15 + $0x138] sm:$0xff]  ;;  %v1899_v25 = vld [vmem:[#allocation15 + $0xd0] sm:$0xff] }
 0x3f3   :  { %v2500_v22 = vpop.f32.mrf.mxu1  ;;  %v1907_v30 = vld [vmem:[#allocation15 + $0x110] sm:$0xff] }
 0x3f4   :  { %v2501_v36 = vadd.f32 %v2500_v22, %v2499_v20  ;;  %v1433_v38 = vadd.f32 %v2244_v37, %v1412_v19  ;;  %v1915_v20 = vld [vmem:[#allocation15 + $0x150] sm:$0xff]  ;;  %v1914_v22 = vld [vmem:[#allocation15 + $0x148] sm:$0xff] }
 0x3f5   :  { %v2502_v23 = vpop.f32.mrf.mxu1  ;;  %v1882_v19 = vld [vmem:[#allocation15 + $0x48] sm:$0xff] }
 0x3f6   :  { %v1417_v40 = vadd.f32 %v2501_v36, %v1416_v21  ;;  %v1437_v44 = vmax.f32 %v1433_v38, 0.0  ;;  %v1909_v36 = vld [vmem:[#allocation15 + $0x120] sm:$0xff]  ;;  %v1880_v38 = vld [vmem:[#allocation15 + $0x38] sm:$0xff] }
 0x3f7   :  { %v2503_v27 = vpop.f32.mrf.mxu1  ;;  %v1908_v21 = vld [vmem:[#allocation15 + $0x118] sm:$0xff] }
 0x3f8   :  { %v2504_v34 = vadd.f32 %v2503_v27, %v2502_v23  ;;  %v1434_v47 = vadd.f32 %v2244_v37, %v1417_v40  ;;  %v1913_v23 = vld [vmem:[#allocation15 + $0x140] sm:$0xff]  ;;  %v1911_v27 = vld [vmem:[#allocation15 + $0x130] sm:$0xff]  ;;  %v1894_v40 = vld [vmem:[#allocation15 + $0xa8] sm:$0xff] }
 0x3fa   :  { %v1422_v39 = vadd.f32 %v2879_v33, %v2504_v34  ;;  %v1438_v31 = vmax.f32 %v1434_v47, 0.0  ;;  %v1910_v33 = vld [vmem:[#allocation15 + $0x128] sm:$0xff]  ;;  %v1897_v34 = vld [vmem:[#allocation15 + $0xc0] sm:$0xff]  ;;  %v1876_v47 = vld [vmem:[#allocation15 + $0x18] sm:$0xff] }
 0x3fc   :  { %v1435_v43 = vadd.f32 %v2244_v37, %v1422_v39  ;;  %v1896_v37 = vld [vmem:[#allocation15 + $0xb8] sm:$0xff]  ;;  %v1895_v39 = vld [vmem:[#allocation15 + $0xb0] sm:$0xff] }
 0x3fe   :  { %v1439_v54 = vmax.f32 %v1435_v43, 0.0  ;;  %v1893_v43 = vld [vmem:[#allocation15 + $0xa0] sm:$0xff] }
 0x409   :  { %v2914_v41 = vpop.f32.mrf.mxu1 }
 0x40a   :  { %v1549_v42 = vadd.f32 %v2914_v41, %v2245_v29  ;;  %v1878_v41 = vld [vmem:[#allocation15 + $0x28] sm:$0xff] }
 0x40b   :  { %v1522_v45 = vpop.f32.mrf.mxu1 }
 0x40c   :  { %v1548_v48 = vadd.f32 %v2245_v29, %v1522_v45  ;;  %v1553_v49 = vadd.f32 %v1549_v42, %v1437_v44  ;;  %v1906_v42 = vld [vmem:[#allocation15 + $0x108] sm:$0xff]  ;;  %v1877_v44 = vld [vmem:[#allocation15 + $0x20] sm:$0xff] }
 0x40d   :  { %v2917_v50 = vpop.f32.mrf.mxu1  ;;  %v1905_v45 = vld [vmem:[#allocation15 + $0x100] sm:$0xff] }
 0x40e   :  { %v1552_v52 = vadd.f32 %v1548_v48, %v1436_v46  ;;  %v1551_v53 = vadd.f32 %v2917_v50, %v2245_v29  ;;  %v3542_v58 = vmax.f32 %v1553_v49, 0.0  ;;  %v1892_v46 = vld [vmem:[#allocation15 + $0x98] sm:$0xff]  ;;  %v1891_v48 = vld [vmem:[#allocation15 + $0x90] sm:$0xff]  ;;  %v1890_v50 = vld [vmem:[#allocation15 + $0x88] sm:$0xff] }
 0x40f   :  { %v1532_v55 = vpop.f32.mrf.mxu1  ;;  %v1875_v49 = vld [vmem:[#allocation15 + $0x10] sm:$0xff] }
 0x410   :  { %v3540_v56 = vmax.f32 %v1552_v52, 0.0  ;;  %v1550_v57 = vadd.f32 %v2245_v29, %v1532_v55  ;;  %v1555_v59 = vadd.f32 %v1551_v53, %v1439_v54  ;;  %v1571_v2 = vrot.slane %v3542_v58, 4  ;;  %v1879_v29 = vld [vmem:[#allocation15 + $0x30] sm:$0xff]  ;;  %v1874_v52 = vld [vmem:[#allocation15 + $0x8] sm:$0xff]  ;;  %v1889_v53 = vld [vmem:[#allocation15 + $0x80] sm:$0xff] }
 0x411   :  { %v1873_v54 = vld [vmem:[#allocation15] sm:$0xff] }
 0x412   :  { %v1570_v60 = vrot.slane %v3540_v56, 4  ;;  %v1554_v61 = vadd.f32 %v1550_v57, %v1438_v31  ;;  %2950 = vmatprep.mubr.f32.mxu1 %v3540_v56  ;;  %v3549_v51 = vmax.f32 %v1555_v59, 0.0 }
 0x413   :  { %2951 = vmatmul.mubr.f32.vlgmr.msra.gmra.mxu1 %v3542_v58 }
 0x414   :  { %1580 = vst [vmem:[#allocation2 + $0x40] sm:$0xf0] %v1570_v60  ;;  %v3547_v63 = vmax.f32 %v1554_v61, 0.0  ;;  %2957 = vmatpush3.msra.mxu1 %v1920_v14  ;;  %v1572_v7 = vsel %vm875_vm2, %v1570_v60, %v1571_v2  ;;  %v1574_v14 = vrot.slane %v3549_v51, 4  ;;  %v2246_v61 = vld [vmem:[%s3660_s14] ss:$0 sm:$0xff] }
 0x415   :  { %2958 = vmatprep.subr.mxu1 %v1919_v62 }
 0x416   :  { %v1573_v32 = vrot.slane %v3547_v63, 4  ;;  %2953 = vmatprep.mubr.f32.mxu1 %v3547_v63  ;;  %2959 = vmatpush3.msra.mxu1 %v1919_v62 }
 0x417   :  { %2954 = vmatmul.mubr.f32.gmra.mxu1 %v3549_v51  ;;  %2960 = vmatprep.subr.mxu1 %v1918_v0 }
 0x418   :  { %1582 = vst [vmem:[#allocation2 + $0x8] sm:$0xf0] %v1573_v32  ;;  %2961 = vmatpush3.msra.mxu1 %v1918_v0  ;;  %v1575_v15 = vsel %vm875_vm2, %v1573_v32, %v1574_v14 }
 0x419   :  { %2962 = vmatprep.subr.mxu1 %v1917_v5 }
 0x41a   :  { %2963 = vmatpush3.msra.mxu1 %v1917_v5 }
 0x41b   :  { %v1589_v3 = vld [vmem:[#allocation2 + $0x40] sm:$0xff]  ;;  %2964 = vmatprep.subr.mxu1 %v1916_v18 }
 0x41c   :  { %1712 = vmatprep.mubr.f32.mxu0 %v1589_v3  ;;  %1837 = vst [vmem:[#allocation2 + $0x40] sm:$0xf] %v3221_v1  ;;  %2965 = vmatpush3.msra.mxu1 %v1916_v18 }
 0x41d   :  { %1713 = vmatmul.mubr.f32.vlgmr.msra.gmra.mxu0 %v3221_v1  ;;  %2966 = vmatprep.subr.mxu1 %v1915_v20 }
 0x41e   :  { %1717 = vmatprep.mubr.f32.mxu0 %v1572_v7  ;;  %2610 = vmatpush3.msra.mxu0 %v1888_v4 }
 0x41f   :  { %v1595_v10 = vld [vmem:[#allocation2 + $0x8] sm:$0xff]  ;;  %2611 = vmatprep.subr.mxu0 %v1903_v6  ;;  %2967 = vmatpush3.msra.mxu1 %v1915_v20 }
 0x420   :  { %1838 = vst [vmem:[#allocation2 + $0x8] sm:$0xf] %v3221_v1  ;;  %2612 = vmatpush3.msra.mxu0 %v1887_v8  ;;  %2968 = vmatprep.subr.mxu1 %v1914_v22 }
 0x421   :  { %1718 = vmatmul.mubr.f32.gmra.mxu0 %v3540_v56  ;;  %2613 = vmatprep.subr.mxu0 %v1902_v9 }
 0x422   :  { %1722 = vmatprep.mubr.f32.mxu0 %v1595_v10  ;;  %2614 = vmatpush3.msra.mxu0 %v1886_v11 }
 0x423   :  { %2615 = vmatprep.subr.mxu0 %v1901_v12  ;;  %2969 = vmatpush3.msra.mxu1 %v1914_v22 }
 0x424   :  { %2616 = vmatpush3.msra.mxu0 %v1885_v13  ;;  %2970 = vmatprep.subr.mxu1 %v1913_v23 }
 0x425   :  { %1723 = vmatmul.mubr.f32.gmra.mxu0 %v3221_v1  ;;  %2617 = vmatprep.subr.mxu0 %v1900_v16 }
 0x426   :  { %1727 = vmatprep.mubr.f32.mxu0 %v1575_v15  ;;  %2618 = vmatpush3.msra.mxu0 %v1884_v17 }
 0x427   :  { %2971 = vmatpush3.msra.mxu1 %v1913_v23  ;;  %2619 = vmatprep.subr.mxu0 %v1899_v25 }
 0x428   :  { %2972 = vmatprep.subr.mxu1 %v1912_v24  ;;  %2620 = vmatpush3.msra.mxu0 %v1883_v26 }
 0x429   :  { %1728 = vmatmul.mubr.f32.gmra.mxu0 %v3547_v63  ;;  %2973 = vmatpush3.msra.mxu1 %v1912_v24 }
 0x42a   :  { %2974 = vmatprep.subr.mxu1 %v1911_v27  ;;  %2621 = vmatprep.subr.mxu0 %v1898_v28 }
 0x42b   :  { %2975 = vmatpush3.msra.mxu1 %v1911_v27  ;;  %2622 = vmatpush3.msra.mxu0 %v1882_v19 }
 0x42c   :  { %2976 = vmatprep.subr.mxu1 %v1910_v33  ;;  %2623 = vmatprep.subr.mxu0 %v1897_v34 }
 0x42d   :  { %2977 = vmatpush3.msra.mxu1 %v1910_v33  ;;  %2624 = vmatpush3.msra.mxu0 %v1881_v35  ;;  %v2146_v35 = vld [vmem:[%s3663_s17 + $0x78] sm:$0xff] }
 0x42e   :  { %2978 = vmatprep.subr.mxu1 %v1909_v36  ;;  %2625 = vmatprep.subr.mxu0 %v1896_v37  ;;  %v2144_v37 = vld [vmem:[%s3663_s17 + $0x68] sm:$0xff] }
 0x42f   :  { %2979 = vmatpush3.msra.mxu1 %v1909_v36  ;;  %2626 = vmatpush3.msra.mxu0 %v1880_v38  ;;  %v2145_v36 = vld [vmem:[%s3663_s17 + $0x70] sm:$0xff]  ;;  %v2143_v38 = vld [vmem:[%s3663_s17 + $0x60] sm:$0xff] }
 0x430   :  { %2980 = vmatprep.subr.mxu1 %v1908_v21  ;;  %2627 = vmatprep.subr.mxu0 %v1895_v39  ;;  %v2141_v39 = vld [vmem:[%s3663_s17 + $0x50] sm:$0xff] }
 0x431   :  { %2981 = vmatpush3.msra.mxu1 %v1908_v21  ;;  %2628 = vmatpush3.msra.mxu0 %v1879_v29  ;;  %v2142_v21 = vld [vmem:[%s3663_s17 + $0x58] sm:$0xff]  ;;  %v2140_v29 = vld [vmem:[%s3663_s17 + $0x48] sm:$0xff] }
 0x432   :  { %2982 = vmatprep.subr.mxu1 %v1907_v30  ;;  %2629 = vmatprep.subr.mxu0 %v1894_v40  ;;  %v2138_v40 = vld [vmem:[%s3663_s17 + $0x38] sm:$0xff] }
 0x433   :  { %2983 = vmatpush3.msra.mxu1 %v1907_v30  ;;  %2630 = vmatpush3.msra.mxu0 %v1878_v41  ;;  %v2139_v30 = vld [vmem:[%s3663_s17 + $0x40] sm:$0xff]  ;;  %v2137_v41 = vld [vmem:[%s3663_s17 + $0x30] sm:$0xff] }
 0x434   :  { %2984 = vmatprep.subr.mxu1 %v1906_v42  ;;  %2631 = vmatprep.subr.mxu0 %v1893_v43  ;;  %v2135_v43 = vld [vmem:[%s3663_s17 + $0x20] sm:$0xff] }
 0x435   :  { %2985 = vmatpush3.msra.mxu1 %v1906_v42  ;;  %2632 = vmatpush3.msra.mxu0 %v1877_v44  ;;  %v2136_v42 = vld [vmem:[%s3663_s17 + $0x28] sm:$0xff]  ;;  %v2134_v44 = vld [vmem:[%s3663_s17 + $0x18] sm:$0xff] }
 0x436   :  { %2986 = vmatprep.subr.mxu1 %v1905_v45  ;;  %2633 = vmatprep.subr.mxu0 %v1892_v46  ;;  %v2132_v46 = vld [vmem:[%s3663_s17 + $0x8] sm:$0xff] }
 0x437   :  { %2987 = vmatpush3.msra.mxu1 %v1905_v45  ;;  %2634 = vmatpush3.msra.mxu0 %v1876_v47  ;;  %v2133_v45 = vld [vmem:[%s3663_s17 + $0x10] sm:$0xff]  ;;  %v2131_v47 = vld [vmem:[%s3663_s17] sm:$0xff] }
 0x438   :  { %2635 = vmatprep.subr.mxu0 %v1891_v48 }
 0x439   :  { %2636 = vmatpush3.msra.mxu0 %v1875_v49 }
 0x43a   :  { %2637 = vmatprep.subr.mxu0 %v1890_v50 }
 0x43b   :  { %2638 = vmatpush3.msra.mxu0 %v1874_v52 }
 0x43c   :  { %2639 = vmatprep.subr.mxu0 %v1889_v53 }
 0x43d   :  { %2640 = vmatpush3.msra.mxu0 %v1873_v54  ;;  %v2247_v54 = vld [vmem:[%s3662_s16] ss:$0 sm:$0xff] }
 0x43e   :  { %2994 = vmatprep.subr.mxu0 %v3221_v1 }
 0x4d3   :  { %v2952_v55 = vpop.f32.mrf.mxu1 }
 0x4d5   :  { %v1799_v60 = vpop.f32.mrf.mxu1 }
 0x4d7   :  { %v2955_v3 = vpop.f32.mrf.mxu1 }
 0x4d9   :  { %v1809_v12 = vpop.f32.mrf.mxu1 }
 0x4dd   :  { %v2577_v31 = vpop.f32.mrf.mxu0 }
 0x4df   :  { %v2578_v57 = vpop.f32.mrf.mxu0 }
 0x4e0   :  { %v2579_v59 = vadd.f32 %v2578_v57, %v2577_v31 }
 0x4e1   :  { %v2580_v62 = vpop.f32.mrf.mxu0 }
 0x4e2   :  { %v1800_v0 = vadd.f32 %v2579_v59, %v1799_v60 }
 0x4e3   :  { %v2581_v32 = vpop.f32.mrf.mxu0 }
 0x4e4   :  { %v1825_v5 = vadd.f32 %v2246_v61, %v1800_v0  ;;  %v2582_v2 = vadd.f32 %v2581_v32, %v2580_v62 }
 0x4e5   :  { %v2583_v4 = vpop.f32.mrf.mxu0 }
 0x4e6   :  { %v1829_v6 = vmax.f32 %v1825_v5, 0.0  ;;  %v1805_v7 = vadd.f32 %v2952_v55, %v2582_v2 }
 0x4e7   :  { %v2584_v8 = vpop.f32.mrf.mxu0 }
 0x4e8   :  { %v1843_v9 = vrot.slane %v1829_v6, 4  ;;  %v1826_v10 = vadd.f32 %v2246_v61, %v1805_v7  ;;  %v2585_v11 = vadd.f32 %v2584_v8, %v2583_v4  ;;  %2988 = vmatprep.mubr.f32.mxu1 %v1829_v6 }
 0x4e9   :  { %v2586_v13 = vpop.f32.mrf.mxu0 }
 0x4ea   :  { %1853 = vst [vmem:[#allocation2 + $0x40] sm:$0xf0] %v1843_v9  ;;  %v1830_v14 = vmax.f32 %v1826_v10, 0.0  ;;  %v1810_v15 = vadd.f32 %v2585_v11, %v1809_v12 }
 0x4eb   :  { %v2587_v16 = vpop.f32.mrf.mxu0 }
 0x4ec   :  { %v1844_v17 = vrot.slane %v1830_v14, 4  ;;  %v1827_v18 = vadd.f32 %v2246_v61, %v1810_v15  ;;  %v2588_v20 = vadd.f32 %v2587_v16, %v2586_v13  ;;  %2989 = vmatmul.mubr.f32.vlgmr.msra.gmra.mxu1 %v1830_v14 }
 0x4ee   :  { %v1845_v22 = vsel %vm875_vm2, %v1843_v9, %v1844_v17  ;;  %v1831_v23 = vmax.f32 %v1827_v18, 0.0  ;;  %v1815_v24 = vadd.f32 %v2955_v3, %v2588_v20 }
 0x4f0   :  { %v1846_v25 = vrot.slane %v1831_v23, 4  ;;  %v1828_v26 = vadd.f32 %v2246_v61, %v1815_v24  ;;  %2991 = vmatprep.mubr.f32.mxu1 %v1831_v23 }
 0x4f1   :  { %v1862_v27 = vld [vmem:[#allocation2 + $0x40] sm:$0xff] }
 0x4f2   :  { %1855 = vst [vmem:[#allocation2 + $0x8] sm:$0xf0] %v1846_v25  ;;  %v1832_v28 = vmax.f32 %v1828_v26, 0.0  ;;  %1985 = vmatprep.mubr.f32.mxu0 %v1862_v27 }
 0x4f3   :  { %1986 = vmatmul.mubr.f32.vlgmr.msra.gmra.mxu0 %v3221_v1 }
 0x4f4   :  { %v1847_v19 = vrot.slane %v1832_v28, 4  ;;  %1990 = vmatprep.mubr.f32.mxu0 %v1845_v22  ;;  %2992 = vmatmul.mubr.f32.gmra.mxu1 %v1832_v28 }
 0x4f5   :  { %2995 = vmatpush3.msra.mxu0 %v2146_v35 }
 0x4f6   :  { %v1848_v33 = vsel %vm875_vm2, %v1846_v25, %v1847_v19  ;;  %2996 = vmatprep.subr.mxu0 %v3221_v1 }
 0x4f7   :  { %1991 = vmatmul.mubr.f32.gmra.mxu0 %v1829_v6 }
 0x4f8   :  { %2997 = vmatpush3.msra.mxu0 %v2145_v36 }
 0x4f9   :  { %v1868_v34 = vld [vmem:[#allocation2 + $0x8] sm:$0xff]  ;;  %2998 = vmatprep.subr.mxu0 %v3221_v1 }
 0x4fa   :  { %1995 = vmatprep.mubr.f32.mxu0 %v1868_v34  ;;  %2999 = vmatpush3.msra.mxu0 %v2144_v37 }
 0x4fb   :  { %1996 = vmatmul.mubr.f32.gmra.mxu0 %v3221_v1  ;;  %3000 = vmatprep.subr.mxu0 %v3221_v1 }
 0x4fc   :  { %2000 = vmatprep.mubr.f32.mxu0 %v1848_v33  ;;  %3001 = vmatpush3.msra.mxu0 %v2143_v38 }
 0x4fd   :  { %3002 = vmatprep.subr.mxu0 %v3221_v1 }
 0x4fe   :  { %3003 = vmatpush3.msra.mxu0 %v2142_v21 }
 0x4ff   :  { %2001 = vmatmul.mubr.f32.gmra.mxu0 %v1831_v23  ;;  %3004 = vmatprep.subr.mxu0 %v3221_v1 }
 0x500   :  { %3005 = vmatpush3.msra.mxu0 %v2141_v39  ;;  %3026 = vmatprep.mubr.msk.f32.mxu0 %vm3222_vm3, %v3221_v1 }
 0x501   :  { %3006 = vmatprep.subr.mxu0 %v3221_v1 }
 0x502   :  { %3007 = vmatpush3.msra.mxu0 %v2140_v29 }
 0x503   :  { %3008 = vmatprep.subr.mxu0 %v3221_v1 }
 0x504   :  { %3009 = vmatpush3.msra.mxu0 %v2139_v30  ;;  %v2248_v30 = vld [vmem:[#allocation3] ss:$0 sm:$0xff] }
 0x505   :  { %3010 = vmatprep.subr.mxu0 %v3221_v1 }
 0x506   :  { %3011 = vmatpush3.msra.mxu0 %v2138_v40 }
 0x507   :  { %3012 = vmatprep.subr.mxu0 %v3221_v1 }
 0x508   :  { %3013 = vmatpush3.msra.mxu0 %v2137_v41 }
 0x509   :  { %3014 = vmatprep.subr.mxu0 %v3221_v1 }
 0x50a   :  { %3015 = vmatpush3.msra.mxu0 %v2136_v42 }
 0x50b   :  { %3016 = vmatprep.subr.mxu0 %v3221_v1 }
 0x50c   :  { %3017 = vmatpush3.msra.mxu0 %v2135_v43 }
 0x50d   :  { %3018 = vmatprep.subr.mxu0 %v3221_v1 }
 0x50e   :  { %3019 = vmatpush3.msra.mxu0 %v2134_v44 }
 0x50f   :  { %3020 = vmatprep.subr.mxu0 %v3221_v1 }
 0x510   :  { %3021 = vmatpush3.msra.mxu0 %v2133_v45 }
 0x511   :  { %3022 = vmatprep.subr.mxu0 %v3221_v1 }
 0x512   :  { %3023 = vmatpush3.msra.mxu0 %v2132_v46 }
 0x513   :  { %3024 = vmatprep.subr.mxu0 %v3221_v1 }
 0x514   :  { %3025 = vmatpush3.msra.mxu0 %v2131_v47 }
 0x5ac   :  { %v2990_v49 = vpop.f32.mrf.mxu1 }
 0x5ae   :  { %v2072_v53 = vpop.f32.mrf.mxu1 }
 0x5b3   :  { %v2641_v48 = vpop.f32.mrf.mxu0 }
 0x5b4   :  { %v2993_v62 = vpop.f32.mrf.mxu1 }
 0x5b5   :  { %v2642_v50 = vpop.f32.mrf.mxu0 }
 0x5b6   :  { %v2643_v52 = vadd.f32 %v2642_v50, %v2641_v48  ;;  %v2082_v3 = vpop.f32.mrf.mxu1 }
 0x5b7   :  { %v2644_v55 = vpop.f32.mrf.mxu0 }
 0x5b8   :  { %v2073_v31 = vadd.f32 %v2643_v52, %v2072_v53 }
 0x5b9   :  { %v2645_v57 = vpop.f32.mrf.mxu0 }
 0x5ba   :  { %v2098_v59 = vadd.f32 %v2247_v54, %v2073_v31  ;;  %v2646_v60 = vadd.f32 %v2645_v57, %v2644_v55 }
 0x5bb   :  { %v2647_v61 = vpop.f32.mrf.mxu0 }
 0x5bc   :  { %v2102_v0 = vmax.f32 %v2098_v59, 0.0  ;;  %v2078_v32 = vadd.f32 %v2990_v49, %v2646_v60 }
 0x5bd   :  { %v2648_v1 = vpop.f32.mrf.mxu0 }
 0x5be   :  { %v2099_v5 = vadd.f32 %v2247_v54, %v2078_v32  ;;  %v2649_v2 = vadd.f32 %v2648_v1, %v2647_v61  ;;  %v2106_v6 = vadd.f32 %v2102_v0, %v3540_v56 }
 0x5bf   :  { %v2650_v4 = vpop.f32.mrf.mxu0 }
 0x5c0   :  { %v2103_v7 = vmax.f32 %v2099_v5, 0.0  ;;  %v2083_v8 = vadd.f32 %v2649_v2, %v2082_v3  ;;  %v2110_v13 = vmax.f32 %v2106_v6, 0.0 }
 0x5c1   :  { %v2651_v9 = vpop.f32.mrf.mxu0 }
 0x5c2   :  { %v2107_v10 = vadd.f32 %v2103_v7, %v3542_v58  ;;  %v2100_v11 = vadd.f32 %v2247_v54, %v2083_v8  ;;  %v2652_v12 = vadd.f32 %v2651_v9, %v2650_v4 }
 0x5c4   :  { %v2111_v14 = vmax.f32 %v2107_v10, 0.0  ;;  %v2104_v15 = vmax.f32 %v2100_v11, 0.0  ;;  %v2088_v16 = vadd.f32 %v2993_v62, %v2652_v12 }
 0x5c6   :  { %v2114_v17 = vadd.f32 %v2111_v14, %v2110_v13  ;;  %v2101_v18 = vadd.f32 %v2247_v54, %v2088_v16  ;;  %v2108_v22 = vadd.f32 %v2104_v15, %v3547_v63 }
 0x5c8   :  { %v2115_v20 = vrot.slane %v2114_v17, 4  ;;  %v2105_v23 = vmax.f32 %v2101_v18, 0.0  ;;  %v2112_v26 = vmax.f32 %v2108_v22, 0.0 }
 0x5ca   :  { %v2116_v24 = vadd.f32 %v2115_v20, %v2114_v17  ;;  %v2109_v56 = vadd.f32 %v2105_v23, %v3549_v51 }
 0x5cc   :  { %v2117_v25 = vrot.slane %v2116_v24, 2  ;;  %v2113_v27 = vmax.f32 %v2109_v56, 0.0 }
 0x5ce   :  { %v2121_v28 = vadd.f32 %v2113_v27, %v2112_v26  ;;  %v2118_v19 = vadd.f32 %v2117_v25, %v2116_v24 }
 0x5d0   :  { %v2122_v58 = vrot.slane %v2121_v28, 4  ;;  %v2119_v35 = vrot.slane %v2118_v19, 1 }
 0x5d2   :  { %v2123_v33 = vadd.f32 %v2122_v58, %v2121_v28  ;;  %v2120_v37 = vadd.f32 %v2119_v35, %v2118_v19 }
 0x5d4   :  { %v2124_v34 = vrot.slane %v2123_v33, 2  ;;  %v2129_v39 = vmul.f32 0.0625, %v2120_v37 }
 0x5d6   :  { %v2125_v36 = vadd.f32 %v2124_v34, %v2123_v33 }
 0x5d8   :  { %v2126_v38 = vrot.slane %v2125_v36, 1 }
 0x5da   :  { %v2127_v21 = vadd.f32 %v2126_v38, %v2125_v36 }
 0x5dc   :  { %v2130_v63 = vmul.f32 0.0625, %v2127_v21 }
 0x5de   :  { %v2157_v29 = vsel %vm2156_vm4, %v2130_v63, %v2129_v39 }
 0x5df   :  { %3027 = vmatmul.mubr.f32.vlgmr.msra.gmra.mxu0 %v2157_v29 }
 0x69f   :  { %v2225_v51 = vpop.f32.mrf.mxu0 }
 0x6a0   :  { %v2226_v40 = vadd.f32 %v2248_v30, %v2225_v51 }
 0x6a1   :  { %v3028_v41 = vpop.f32.mrf.mxu0 }
 0x6a2   :  { %2230 = vst.msk [vmem:[%s3665_s19] sm:$0x3] %vm2229_vm5, %v2226_v40 }
 0x6a3   :  { %2235 = vsyncpa [#allocation5], 1 }
 0x6a4   :  { %2236 = vsyncpa [#allocation7], 1 }
 0x6a5   :  { %2237 = vsyncpa [#allocation10], 1 }
 0x6a6   :  { %2238 = vsyncpa [#allocation13], 1 }
 0x6a7   :  { %2239 = vsyncpa [#allocation16], 1 }

</bundles_post_ra>
